<compile_context>
chip_gen: v6e
topology: v6e:2x2x1
jax: 0.10.0
libtpu: 0.0.40
codegen_flags: <defaults>
</compile_context>

<pallas_src>
import jax
import jax.numpy as jnp
from jax import lax
from jax.experimental import pallas as pl
from jax.experimental.pallas import tpu as pltpu


# ----------------------------------------------------------------------------
# Pallas kernel: one batch element per grid step.
# ----------------------------------------------------------------------------
def _base_afm_kernel(high_ref, rgb_ref, t_ref,               # VMEM tensors
                     mh_ref, mwt_ref,                        # VMEM interp matrices
                     wt_ref, b1_ref, wf_ref, bf_ref, bd_ref,  # SMEM scalars
                     out_ref):
    _, C, Hh, Wh = high_ref.shape
    _, Ct, H, W = t_ref.shape
    OC = out_ref.shape[1]

    high = high_ref[0].astype(jnp.float32)   # (C, Hh, Wh)
    rgb = rgb_ref[0].astype(jnp.float32)     # (C, H, W)
    t = t_ref[0].astype(jnp.float32)         # (Ct, H, W)
    mwt = mwt_ref[...]                       # (Wh, W)
    cols = [mh_ref[i] for i in range(Hh)]    # Hh x (H, 1) columns of Mh

    # Per-channel planes of  s = rgb + upsample(high) + relu(convt(t)).
    s_planes = []
    for c in range(C):
        # Separable bilinear upsample of high[c]:
        #   H-direction: Hh unrolled VPU FMAs; W-direction: one small MXU matmul.
        acc = cols[0] * high[c, 0:1, :]                    # (H,1)*(1,Wh) -> (H,Wh)
        for i in range(1, Hh):
            acc = acc + cols[i] * high[c, i:i + 1, :]
        up_c = jnp.dot(acc, mwt, preferred_element_type=jnp.float32)   # (H, W)

        # convt: 1x1 conv (BN folded into weights) + ReLU, unrolled VPU FMAs.
        tc = jnp.full((H, W), b1_ref[c], jnp.float32)
        for ci in range(Ct):
            tc = tc + wt_ref[ci, c] * t[ci]

        s_planes.append(rgb[c] + up_c + jnp.maximum(tc, 0.0))

    # convout: BN -> 1x1 conv (padding=1) -> BN -> ReLU, all folded.
    # Zero-padded border == relu(bn3 bias) per channel; interior is an FMA.
    for co in range(OC):
        out_ref[0, co] = jnp.full((H + 2, W + 2), bd_ref[co], out_ref.dtype)
        acc = jnp.full((H, W), bf_ref[co], jnp.float32)
        for ci in range(C):
            acc = acc + wf_ref[ci, co] * s_planes[ci]
        out_ref[0, co, 1:H + 1, 1:W + 1] = jnp.maximum(acc, 0.0).astype(out_ref.dtype)


# ----------------------------------------------------------------------------
# Wrapper (NCHW in / NCHW out, no transposes, no host-side resize)
# ----------------------------------------------------------------------------
def _interp_matrix(out_size, in_size):
    """(out_size, in_size) bilinear matrix, PyTorch align_corners=False."""
    o = jnp.arange(out_size, dtype=jnp.float32)
    src = (o + 0.5) * (in_size / out_size) - 0.5
    src = jnp.clip(src, 0.0, float(in_size - 1))
    i0 = jnp.floor(src).astype(jnp.int32)
    i1 = jnp.minimum(i0 + 1, in_size - 1)
    w = src - i0.astype(jnp.float32)
    return (jax.nn.one_hot(i0, in_size, dtype=jnp.float32) * (1.0 - w)[:, None]
            + jax.nn.one_hot(i1, in_size, dtype=jnp.float32) * w[:, None])


def base_afm_pallas(high, rgb, t, kp):
    """high (N,C,Hh,Wh), rgb (N,C,H,W), t (N,Ct,H,W) -> (N,OC,H+2,W+2)."""
    N, C, H, W = rgb.shape
    _, Ch, Hh, Wh = high.shape
    Ct = t.shape[1]
    OC = kp["wfin"].shape[1]
    assert Ch == C and t.shape[2:] == (H, W)

    # Separable interpolation matrices (tiny; built host-side per shape).
    mh_cols = jnp.transpose(_interp_matrix(H, Hh))[:, :, None]    # (Hh, H, 1)
    mwt = jnp.transpose(_interp_matrix(W, Wh))                    # (Wh, W)

    def smem():
        return pl.BlockSpec(memory_space=pltpu.MemorySpace.SMEM)

    return pl.pallas_call(
        _base_afm_kernel,
        out_shape=jax.ShapeDtypeStruct((N, OC, H + 2, W + 2), jnp.float32),
        grid=(N,),
        in_specs=[
            pl.BlockSpec((1, C, Hh, Wh), lambda n: (n, 0, 0, 0)),
            pl.BlockSpec((1, C, H, W), lambda n: (n, 0, 0, 0)),
            pl.BlockSpec((1, Ct, H, W), lambda n: (n, 0, 0, 0)),
            pl.BlockSpec((Hh, H, 1), lambda n: (0, 0, 0)),     # Mh columns
            pl.BlockSpec((Wh, W), lambda n: (0, 0)),           # Mw^T
            smem(), smem(), smem(), smem(), smem(),            # folded scalars
        ],
        out_specs=pl.BlockSpec((1, OC, H + 2, W + 2), lambda n: (n, 0, 0, 0)),
        compiler_params=pltpu.CompilerParams(dimension_semantics=("parallel",)),
    )(high.astype(jnp.float32), rgb.astype(jnp.float32), t.astype(jnp.float32),
      mh_cols, mwt,
      kp["wt"], kp["b1"], kp["wfin"], kp["bfin"], kp["border"])


# ----------------------------------------------------------------------------
# Deterministic parameters + BN (eval-mode) folding
# ----------------------------------------------------------------------------
def _bn_raw(key, ch):
    k1, k2, k3, k4 = jax.random.split(key, 4)
    gamma = 1.0 + 0.1 * jax.random.normal(k1, (ch,), jnp.float32)
    beta = 0.1 * jax.random.normal(k2, (ch,), jnp.float32)
    mean = 0.1 * jax.random.normal(k3, (ch,), jnp.float32)
    var = 1.0 + 0.1 * jax.random.uniform(k4, (ch,), jnp.float32)
    return gamma, beta, mean, var


def _fold_bn(p, eps=1e-5):
    gamma, beta, mean, var = p
    s = gamma / jnp.sqrt(var + eps)
    return s, beta - mean * s


def init_params(key, in_ch, t_ch, out_ch):
    ks = jax.random.split(key, 5)
    raw = {
        "wt": 0.3 * jax.random.normal(ks[0], (in_ch, t_ch, 1, 1), jnp.float32),
        "wo": 0.3 * jax.random.normal(ks[1], (out_ch, in_ch, 1, 1), jnp.float32),
        "bn1": _bn_raw(ks[2], in_ch),     # after convt
        "bn2": _bn_raw(ks[3], in_ch),     # convout pre-BN
        "bn3": _bn_raw(ks[4], out_ch),    # convout post-BN
    }
    s1, b1 = _fold_bn(raw["bn1"])
    s2, b2 = _fold_bn(raw["bn2"])
    s3, b3 = _fold_bn(raw["bn3"])
    wt2 = raw["wt"].reshape(in_ch, t_ch)       # [co, ci]
    wo2 = raw["wo"].reshape(out_ch, in_ch)     # [co, ci]
    kp = {
        # convt:  t'[co] = relu(sum_ci wt[ci,co]*t[ci] + b1[co])
        "wt": jnp.transpose(wt2 * s1[:, None]),                    # (t_ch, in_ch)
        "b1": b1,                                                  # (in_ch,)
        # convout interior: relu(sum_ci wfin[ci,co]*s[ci] + bfin[co])
        "wfin": jnp.transpose(wo2 * s3[:, None]) * s2[:, None],    # (in_ch, out_ch)
        "bfin": (wo2 @ b2) * s3 + b3,                              # (out_ch,)
        # zero-padded border -> conv(0)=0 -> bn3 -> relu
        "border": jnp.maximum(b3, 0.0),                            # (out_ch,)
    }
    return raw, kp


# ----------------------------------------------------------------------------
# Pure-JAX reference (mirrors the PyTorch module in eval mode; bilinear is an
# independent gather-based implementation of the align_corners=False formula)
# ----------------------------------------------------------------------------
def _bilinear_resize_ref(x, out_h, out_w):
    def coords(out_size, in_size):
        o = jnp.arange(out_size, dtype=jnp.float32)
        src = jnp.maximum((o + 0.5) * (in_size / out_size) - 0.5, 0.0)
        i0 = jnp.minimum(jnp.floor(src).astype(jnp.int32), in_size - 1)
        i1 = jnp.where(i0 < in_size - 1, i0 + 1, i0)
        return i0, i1, src - i0.astype(jnp.float32)
    h0, h1, wh = coords(out_h, x.shape[2])
    w0, w1, ww = coords(out_w, x.shape[3])
    x00 = x[:, :, h0][:, :, :, w0]
    x01 = x[:, :, h0][:, :, :, w1]
    x10 = x[:, :, h1][:, :, :, w0]
    x11 = x[:, :, h1][:, :, :, w1]
    wh = wh[None, None, :, None]
    ww = ww[None, None, None, :]
    top = x00 * (1.0 - ww) + x01 * ww
    bot = x10 * (1.0 - ww) + x11 * ww
    return top * (1.0 - wh) + bot * wh


def _conv1x1_nchw(x, w_oihw, pad):
    return lax.conv_general_dilated(
        x, w_oihw, window_strides=(1, 1), padding=((pad, pad), (pad, pad)),
        dimension_numbers=("NCHW", "OIHW", "NCHW"))


def base_afm_reference(high, rgb, t, raw):
    N, C, H, W = rgb.shape
    hi = _bilinear_resize_ref(high.astype(jnp.float32), H, W)

    def bn(v, p, eps=1e-5):
        g, b, m, var = p
        s = g / jnp.sqrt(var + eps)
        return v * s[None, :, None, None] + (b - m * s)[None, :, None, None]

    t1 = jax.nn.relu(bn(_conv1x1_nchw(t.astype(jnp.float32), raw["wt"], 0), raw["bn1"]))
    s = rgb.astype(jnp.float32) + t1 + hi
    z = _conv1x1_nchw(bn(s, raw["bn2"]), raw["wo"], 1)
    return jax.nn.relu(bn(z, raw["bn3"]))


# ----------------------------------------------------------------------------
if __name__ == "__main__":
    key = jax.random.PRNGKey(0)
    k_h, k_r, k_t, k_p = jax.random.split(key, 4)

    N, IN_CH, T_CH, OUT_CH = 2, 4, 4, 8
    H, W = 16, 16          # rgb / t spatial size
    Hh, Wh = 8, 8          # low-res `high` spatial size

    high = jax.random.normal(k_h, (N, IN_CH, Hh, Wh), jnp.float32)
    rgb = jax.random.normal(k_r, (N, IN_CH, H, W), jnp.float32)
    t = jax.random.normal(k_t, (N, T_CH, H, W), jnp.float32)

    raw_params, kernel_params = init_params(k_p, IN_CH, T_CH, OUT_CH)

    out = base_afm_pallas(high, rgb, t, kernel_params)
    out = jax.block_until_ready(out)
    assert out.shape == (N, OUT_CH, H + 2, W + 2), out.shape

    ref = base_afm_reference(high, rgb, t, raw_params)
    max_err = float(jnp.max(jnp.abs(out - ref)))
    if not bool(jnp.allclose(out, ref, atol=1e-3, rtol=1e-3)):
        raise SystemExit(f"MISMATCH: max_abs_err={max_err}")
    print("KERNEL_OK")
</pallas_src>

<mosaic_0001>
module attributes {stable_mosaic.version = 11 : i64} {
  func.func @_base_afm_kernel(%arg0: i32, %arg1: memref<1x4x8x8xf32, #tpu.memory_space<vmem>>, %arg2: memref<1x4x16x16xf32, #tpu.memory_space<vmem>>, %arg3: memref<1x4x16x16xf32, #tpu.memory_space<vmem>>, %arg4: memref<8x16x1xf32, #tpu.memory_space<vmem>>, %arg5: memref<8x16xf32, #tpu.memory_space<vmem>>, %arg6: memref<4x4xf32, #tpu.memory_space<smem>>, %arg7: memref<4xf32, #tpu.memory_space<smem>>, %arg8: memref<4x8xf32, #tpu.memory_space<smem>>, %arg9: memref<8xf32, #tpu.memory_space<smem>>, %arg10: memref<8xf32, #tpu.memory_space<smem>>, %arg11: memref<1x8x18x18xf32, #tpu.memory_space<vmem>>) attributes {dimension_semantics = [#tpu.dimension_semantics<parallel>], iteration_bounds = array<i64: 2>, scalar_prefetch = 0 : i64, scratch_operands = 0 : i64, tpu.core_type = #tpu.core_type<tc>, window_params = [{transform_indices = @transform_0, window_bounds = array<i64: 1, 4, 8, 8>}, {transform_indices = @transform_1, window_bounds = array<i64: 1, 4, 16, 16>}, {transform_indices = @transform_2, window_bounds = array<i64: 1, 4, 16, 16>}, {pipeline_mode = #tpu.pipeline_mode<synchronous>, transform_indices = @transform_3, window_bounds = array<i64: 8, 16, 1>}, {pipeline_mode = #tpu.pipeline_mode<synchronous>, transform_indices = @transform_4, window_bounds = array<i64: 8, 16>}, {transform_indices = @transform_5, window_bounds = array<i64: 4, 4>}, {transform_indices = @transform_6, window_bounds = array<i64: 4>}, {transform_indices = @transform_7, window_bounds = array<i64: 4, 8>}, {transform_indices = @transform_8, window_bounds = array<i64: 8>}, {transform_indices = @transform_9, window_bounds = array<i64: 8>}, {transform_indices = @transform_10, window_bounds = array<i64: 1, 8, 18, 18>}]} {
    %c0 = arith.constant 0 : index
    %c0_0 = arith.constant 0 : index
    %c0_1 = arith.constant 0 : index
    %c0_2 = arith.constant 0 : index
    %0 = vector.load %arg1[%c0, %c0_0, %c0_1, %c0_2] : memref<1x4x8x8xf32, #tpu.memory_space<vmem>>, vector<1x4x8x8xf32>
    %1 = vector.shape_cast %0 : vector<1x4x8x8xf32> to vector<4x8x8xf32>
    %c0_3 = arith.constant 0 : index
    %c0_4 = arith.constant 0 : index
    %c0_5 = arith.constant 0 : index
    %c0_6 = arith.constant 0 : index
    %2 = vector.load %arg2[%c0_3, %c0_4, %c0_5, %c0_6] : memref<1x4x16x16xf32, #tpu.memory_space<vmem>>, vector<1x4x16x16xf32>
    %3 = vector.shape_cast %2 : vector<1x4x16x16xf32> to vector<4x16x16xf32>
    %c0_7 = arith.constant 0 : index
    %c0_8 = arith.constant 0 : index
    %c0_9 = arith.constant 0 : index
    %c0_10 = arith.constant 0 : index
    %4 = vector.load %arg3[%c0_7, %c0_8, %c0_9, %c0_10] : memref<1x4x16x16xf32, #tpu.memory_space<vmem>>, vector<1x4x16x16xf32>
    %5 = vector.shape_cast %4 : vector<1x4x16x16xf32> to vector<4x16x16xf32>
    %c0_11 = arith.constant 0 : index
    %c0_12 = arith.constant 0 : index
    %6 = vector.load %arg5[%c0_11, %c0_12] : memref<8x16xf32, #tpu.memory_space<vmem>>, vector<8x16xf32>
    %c0_13 = arith.constant 0 : index
    %c0_14 = arith.constant 0 : index
    %c0_15 = arith.constant 0 : index
    %7 = vector.load %arg4[%c0_13, %c0_14, %c0_15] : memref<8x16x1xf32, #tpu.memory_space<vmem>>, vector<1x16x1xf32>
    %8 = vector.shape_cast %7 : vector<1x16x1xf32> to vector<16x1xf32>
    %c1 = arith.constant 1 : index
    %c0_16 = arith.constant 0 : index
    %c0_17 = arith.constant 0 : index
    %9 = vector.load %arg4[%c1, %c0_16, %c0_17] : memref<8x16x1xf32, #tpu.memory_space<vmem>>, vector<1x16x1xf32>
    %10 = vector.shape_cast %9 : vector<1x16x1xf32> to vector<16x1xf32>
    %c2 = arith.constant 2 : index
    %c0_18 = arith.constant 0 : index
    %c0_19 = arith.constant 0 : index
    %11 = vector.load %arg4[%c2, %c0_18, %c0_19] : memref<8x16x1xf32, #tpu.memory_space<vmem>>, vector<1x16x1xf32>
    %12 = vector.shape_cast %11 : vector<1x16x1xf32> to vector<16x1xf32>
    %c3 = arith.constant 3 : index
    %c0_20 = arith.constant 0 : index
    %c0_21 = arith.constant 0 : index
    %13 = vector.load %arg4[%c3, %c0_20, %c0_21] : memref<8x16x1xf32, #tpu.memory_space<vmem>>, vector<1x16x1xf32>
    %14 = vector.shape_cast %13 : vector<1x16x1xf32> to vector<16x1xf32>
    %c4 = arith.constant 4 : index
    %c0_22 = arith.constant 0 : index
    %c0_23 = arith.constant 0 : index
    %15 = vector.load %arg4[%c4, %c0_22, %c0_23] : memref<8x16x1xf32, #tpu.memory_space<vmem>>, vector<1x16x1xf32>
    %16 = vector.shape_cast %15 : vector<1x16x1xf32> to vector<16x1xf32>
    %c5 = arith.constant 5 : index
    %c0_24 = arith.constant 0 : index
    %c0_25 = arith.constant 0 : index
    %17 = vector.load %arg4[%c5, %c0_24, %c0_25] : memref<8x16x1xf32, #tpu.memory_space<vmem>>, vector<1x16x1xf32>
    %18 = vector.shape_cast %17 : vector<1x16x1xf32> to vector<16x1xf32>
    %c6 = arith.constant 6 : index
    %c0_26 = arith.constant 0 : index
    %c0_27 = arith.constant 0 : index
    %19 = vector.load %arg4[%c6, %c0_26, %c0_27] : memref<8x16x1xf32, #tpu.memory_space<vmem>>, vector<1x16x1xf32>
    %20 = vector.shape_cast %19 : vector<1x16x1xf32> to vector<16x1xf32>
    %c7 = arith.constant 7 : index
    %c0_28 = arith.constant 0 : index
    %c0_29 = arith.constant 0 : index
    %21 = vector.load %arg4[%c7, %c0_28, %c0_29] : memref<8x16x1xf32, #tpu.memory_space<vmem>>, vector<1x16x1xf32>
    %22 = vector.shape_cast %21 : vector<1x16x1xf32> to vector<16x1xf32>
    %23 = vector.extract_strided_slice %1 {offsets = [0, 0, 0], sizes = [1, 1, 8], strides = [1, 1, 1]} : vector<4x8x8xf32> to vector<1x1x8xf32>
    %24 = vector.shape_cast %23 : vector<1x1x8xf32> to vector<1x8xf32>
    %25 = vector.broadcast %8 : vector<16x1xf32> to vector<16x8xf32>
    %26 = vector.broadcast %24 : vector<1x8xf32> to vector<16x8xf32>
    %27 = arith.mulf %25, %26 : vector<16x8xf32>
    %28 = vector.extract_strided_slice %1 {offsets = [0, 1, 0], sizes = [1, 1, 8], strides = [1, 1, 1]} : vector<4x8x8xf32> to vector<1x1x8xf32>
    %29 = vector.shape_cast %28 : vector<1x1x8xf32> to vector<1x8xf32>
    %30 = vector.broadcast %10 : vector<16x1xf32> to vector<16x8xf32>
    %31 = vector.broadcast %29 : vector<1x8xf32> to vector<16x8xf32>
    %32 = arith.mulf %30, %31 : vector<16x8xf32>
    %33 = arith.addf %27, %32 : vector<16x8xf32>
    %34 = vector.extract_strided_slice %1 {offsets = [0, 2, 0], sizes = [1, 1, 8], strides = [1, 1, 1]} : vector<4x8x8xf32> to vector<1x1x8xf32>
    %35 = vector.shape_cast %34 : vector<1x1x8xf32> to vector<1x8xf32>
    %36 = vector.broadcast %12 : vector<16x1xf32> to vector<16x8xf32>
    %37 = vector.broadcast %35 : vector<1x8xf32> to vector<16x8xf32>
    %38 = arith.mulf %36, %37 : vector<16x8xf32>
    %39 = arith.addf %33, %38 : vector<16x8xf32>
    %40 = vector.extract_strided_slice %1 {offsets = [0, 3, 0], sizes = [1, 1, 8], strides = [1, 1, 1]} : vector<4x8x8xf32> to vector<1x1x8xf32>
    %41 = vector.shape_cast %40 : vector<1x1x8xf32> to vector<1x8xf32>
    %42 = vector.broadcast %14 : vector<16x1xf32> to vector<16x8xf32>
    %43 = vector.broadcast %41 : vector<1x8xf32> to vector<16x8xf32>
    %44 = arith.mulf %42, %43 : vector<16x8xf32>
    %45 = arith.addf %39, %44 : vector<16x8xf32>
    %46 = vector.extract_strided_slice %1 {offsets = [0, 4, 0], sizes = [1, 1, 8], strides = [1, 1, 1]} : vector<4x8x8xf32> to vector<1x1x8xf32>
    %47 = vector.shape_cast %46 : vector<1x1x8xf32> to vector<1x8xf32>
    %48 = vector.broadcast %16 : vector<16x1xf32> to vector<16x8xf32>
    %49 = vector.broadcast %47 : vector<1x8xf32> to vector<16x8xf32>
    %50 = arith.mulf %48, %49 : vector<16x8xf32>
    %51 = arith.addf %45, %50 : vector<16x8xf32>
    %52 = vector.extract_strided_slice %1 {offsets = [0, 5, 0], sizes = [1, 1, 8], strides = [1, 1, 1]} : vector<4x8x8xf32> to vector<1x1x8xf32>
    %53 = vector.shape_cast %52 : vector<1x1x8xf32> to vector<1x8xf32>
    %54 = vector.broadcast %18 : vector<16x1xf32> to vector<16x8xf32>
    %55 = vector.broadcast %53 : vector<1x8xf32> to vector<16x8xf32>
    %56 = arith.mulf %54, %55 : vector<16x8xf32>
    %57 = arith.addf %51, %56 : vector<16x8xf32>
    %58 = vector.extract_strided_slice %1 {offsets = [0, 6, 0], sizes = [1, 1, 8], strides = [1, 1, 1]} : vector<4x8x8xf32> to vector<1x1x8xf32>
    %59 = vector.shape_cast %58 : vector<1x1x8xf32> to vector<1x8xf32>
    %60 = vector.broadcast %20 : vector<16x1xf32> to vector<16x8xf32>
    %61 = vector.broadcast %59 : vector<1x8xf32> to vector<16x8xf32>
    %62 = arith.mulf %60, %61 : vector<16x8xf32>
    %63 = arith.addf %57, %62 : vector<16x8xf32>
    %64 = vector.extract_strided_slice %1 {offsets = [0, 7, 0], sizes = [1, 1, 8], strides = [1, 1, 1]} : vector<4x8x8xf32> to vector<1x1x8xf32>
    %65 = vector.shape_cast %64 : vector<1x1x8xf32> to vector<1x8xf32>
    %66 = vector.broadcast %22 : vector<16x1xf32> to vector<16x8xf32>
    %67 = vector.broadcast %65 : vector<1x8xf32> to vector<16x8xf32>
    %68 = arith.mulf %66, %67 : vector<16x8xf32>
    %69 = arith.addf %63, %68 : vector<16x8xf32>
    %cst = arith.constant dense<0.000000e+00> : vector<16x16xf32>
    %70 = tpu.matmul %69, %6, %cst {dimension_numbers = #tpu.dot_dimension_numbers<[1], [0], [0], [1], [0, 0, 1, 1], [], []>} : vector<16x8xf32>, vector<8x16xf32>, vector<16x16xf32> -> vector<16x16xf32>
    %c0_30 = arith.constant 0 : index
    %71 = memref.load %arg7[%c0_30] : memref<4xf32, #tpu.memory_space<smem>>
    %72 = vector.broadcast %71 : f32 to vector<16x16xf32>
    %c0_31 = arith.constant 0 : index
    %c0_32 = arith.constant 0 : index
    %73 = memref.load %arg6[%c0_31, %c0_32] : memref<4x4xf32, #tpu.memory_space<smem>>
    %74 = vector.extract_strided_slice %5 {offsets = [0, 0, 0], sizes = [1, 16, 16], strides = [1, 1, 1]} : vector<4x16x16xf32> to vector<1x16x16xf32>
    %75 = vector.shape_cast %74 : vector<1x16x16xf32> to vector<16x16xf32>
    %76 = vector.broadcast %73 : f32 to vector<16x16xf32>
    %77 = arith.mulf %76, %75 : vector<16x16xf32>
    %78 = arith.addf %72, %77 : vector<16x16xf32>
    %c1_33 = arith.constant 1 : index
    %c0_34 = arith.constant 0 : index
    %79 = memref.load %arg6[%c1_33, %c0_34] : memref<4x4xf32, #tpu.memory_space<smem>>
    %80 = vector.extract_strided_slice %5 {offsets = [1, 0, 0], sizes = [1, 16, 16], strides = [1, 1, 1]} : vector<4x16x16xf32> to vector<1x16x16xf32>
    %81 = vector.shape_cast %80 : vector<1x16x16xf32> to vector<16x16xf32>
    %82 = vector.broadcast %79 : f32 to vector<16x16xf32>
    %83 = arith.mulf %82, %81 : vector<16x16xf32>
    %84 = arith.addf %78, %83 : vector<16x16xf32>
    %c2_35 = arith.constant 2 : index
    %c0_36 = arith.constant 0 : index
    %85 = memref.load %arg6[%c2_35, %c0_36] : memref<4x4xf32, #tpu.memory_space<smem>>
    %86 = vector.extract_strided_slice %5 {offsets = [2, 0, 0], sizes = [1, 16, 16], strides = [1, 1, 1]} : vector<4x16x16xf32> to vector<1x16x16xf32>
    %87 = vector.shape_cast %86 : vector<1x16x16xf32> to vector<16x16xf32>
    %88 = vector.broadcast %85 : f32 to vector<16x16xf32>
    %89 = arith.mulf %88, %87 : vector<16x16xf32>
    %90 = arith.addf %84, %89 : vector<16x16xf32>
    %c3_37 = arith.constant 3 : index
    %c0_38 = arith.constant 0 : index
    %91 = memref.load %arg6[%c3_37, %c0_38] : memref<4x4xf32, #tpu.memory_space<smem>>
    %92 = vector.extract_strided_slice %5 {offsets = [3, 0, 0], sizes = [1, 16, 16], strides = [1, 1, 1]} : vector<4x16x16xf32> to vector<1x16x16xf32>
    %93 = vector.shape_cast %92 : vector<1x16x16xf32> to vector<16x16xf32>
    %94 = vector.broadcast %91 : f32 to vector<16x16xf32>
    %95 = arith.mulf %94, %93 : vector<16x16xf32>
    %96 = arith.addf %90, %95 : vector<16x16xf32>
    %97 = vector.extract_strided_slice %3 {offsets = [0, 0, 0], sizes = [1, 16, 16], strides = [1, 1, 1]} : vector<4x16x16xf32> to vector<1x16x16xf32>
    %98 = vector.shape_cast %97 : vector<1x16x16xf32> to vector<16x16xf32>
    %99 = arith.addf %98, %70 : vector<16x16xf32>
    %cst_39 = arith.constant 0.000000e+00 : f32
    %100 = vector.broadcast %cst_39 : f32 to vector<16x16xf32>
    %101 = arith.maximumf %96, %100 : vector<16x16xf32>
    %102 = arith.addf %99, %101 : vector<16x16xf32>
    %103 = vector.extract_strided_slice %1 {offsets = [1, 0, 0], sizes = [1, 1, 8], strides = [1, 1, 1]} : vector<4x8x8xf32> to vector<1x1x8xf32>
    %104 = vector.shape_cast %103 : vector<1x1x8xf32> to vector<1x8xf32>
    %105 = vector.broadcast %8 : vector<16x1xf32> to vector<16x8xf32>
    %106 = vector.broadcast %104 : vector<1x8xf32> to vector<16x8xf32>
    %107 = arith.mulf %105, %106 : vector<16x8xf32>
    %108 = vector.extract_strided_slice %1 {offsets = [1, 1, 0], sizes = [1, 1, 8], strides = [1, 1, 1]} : vector<4x8x8xf32> to vector<1x1x8xf32>
    %109 = vector.shape_cast %108 : vector<1x1x8xf32> to vector<1x8xf32>
    %110 = vector.broadcast %10 : vector<16x1xf32> to vector<16x8xf32>
    %111 = vector.broadcast %109 : vector<1x8xf32> to vector<16x8xf32>
    %112 = arith.mulf %110, %111 : vector<16x8xf32>
    %113 = arith.addf %107, %112 : vector<16x8xf32>
    %114 = vector.extract_strided_slice %1 {offsets = [1, 2, 0], sizes = [1, 1, 8], strides = [1, 1, 1]} : vector<4x8x8xf32> to vector<1x1x8xf32>
    %115 = vector.shape_cast %114 : vector<1x1x8xf32> to vector<1x8xf32>
    %116 = vector.broadcast %12 : vector<16x1xf32> to vector<16x8xf32>
    %117 = vector.broadcast %115 : vector<1x8xf32> to vector<16x8xf32>
    %118 = arith.mulf %116, %117 : vector<16x8xf32>
    %119 = arith.addf %113, %118 : vector<16x8xf32>
    %120 = vector.extract_strided_slice %1 {offsets = [1, 3, 0], sizes = [1, 1, 8], strides = [1, 1, 1]} : vector<4x8x8xf32> to vector<1x1x8xf32>
    %121 = vector.shape_cast %120 : vector<1x1x8xf32> to vector<1x8xf32>
    %122 = vector.broadcast %14 : vector<16x1xf32> to vector<16x8xf32>
    %123 = vector.broadcast %121 : vector<1x8xf32> to vector<16x8xf32>
    %124 = arith.mulf %122, %123 : vector<16x8xf32>
    %125 = arith.addf %119, %124 : vector<16x8xf32>
    %126 = vector.extract_strided_slice %1 {offsets = [1, 4, 0], sizes = [1, 1, 8], strides = [1, 1, 1]} : vector<4x8x8xf32> to vector<1x1x8xf32>
    %127 = vector.shape_cast %126 : vector<1x1x8xf32> to vector<1x8xf32>
    %128 = vector.broadcast %16 : vector<16x1xf32> to vector<16x8xf32>
    %129 = vector.broadcast %127 : vector<1x8xf32> to vector<16x8xf32>
    %130 = arith.mulf %128, %129 : vector<16x8xf32>
    %131 = arith.addf %125, %130 : vector<16x8xf32>
    %132 = vector.extract_strided_slice %1 {offsets = [1, 5, 0], sizes = [1, 1, 8], strides = [1, 1, 1]} : vector<4x8x8xf32> to vector<1x1x8xf32>
    %133 = vector.shape_cast %132 : vector<1x1x8xf32> to vector<1x8xf32>
    %134 = vector.broadcast %18 : vector<16x1xf32> to vector<16x8xf32>
    %135 = vector.broadcast %133 : vector<1x8xf32> to vector<16x8xf32>
    %136 = arith.mulf %134, %135 : vector<16x8xf32>
    %137 = arith.addf %131, %136 : vector<16x8xf32>
    %138 = vector.extract_strided_slice %1 {offsets = [1, 6, 0], sizes = [1, 1, 8], strides = [1, 1, 1]} : vector<4x8x8xf32> to vector<1x1x8xf32>
    %139 = vector.shape_cast %138 : vector<1x1x8xf32> to vector<1x8xf32>
    %140 = vector.broadcast %20 : vector<16x1xf32> to vector<16x8xf32>
    %141 = vector.broadcast %139 : vector<1x8xf32> to vector<16x8xf32>
    %142 = arith.mulf %140, %141 : vector<16x8xf32>
    %143 = arith.addf %137, %142 : vector<16x8xf32>
    %144 = vector.extract_strided_slice %1 {offsets = [1, 7, 0], sizes = [1, 1, 8], strides = [1, 1, 1]} : vector<4x8x8xf32> to vector<1x1x8xf32>
    %145 = vector.shape_cast %144 : vector<1x1x8xf32> to vector<1x8xf32>
    %146 = vector.broadcast %22 : vector<16x1xf32> to vector<16x8xf32>
    %147 = vector.broadcast %145 : vector<1x8xf32> to vector<16x8xf32>
    %148 = arith.mulf %146, %147 : vector<16x8xf32>
    %149 = arith.addf %143, %148 : vector<16x8xf32>
    %cst_40 = arith.constant dense<0.000000e+00> : vector<16x16xf32>
    %150 = tpu.matmul %149, %6, %cst_40 {dimension_numbers = #tpu.dot_dimension_numbers<[1], [0], [0], [1], [0, 0, 1, 1], [], []>} : vector<16x8xf32>, vector<8x16xf32>, vector<16x16xf32> -> vector<16x16xf32>
    %c1_41 = arith.constant 1 : index
    %151 = memref.load %arg7[%c1_41] : memref<4xf32, #tpu.memory_space<smem>>
    %152 = vector.broadcast %151 : f32 to vector<16x16xf32>
    %c0_42 = arith.constant 0 : index
    %c1_43 = arith.constant 1 : index
    %153 = memref.load %arg6[%c0_42, %c1_43] : memref<4x4xf32, #tpu.memory_space<smem>>
    %154 = vector.extract_strided_slice %5 {offsets = [0, 0, 0], sizes = [1, 16, 16], strides = [1, 1, 1]} : vector<4x16x16xf32> to vector<1x16x16xf32>
    %155 = vector.shape_cast %154 : vector<1x16x16xf32> to vector<16x16xf32>
    %156 = vector.broadcast %153 : f32 to vector<16x16xf32>
    %157 = arith.mulf %156, %155 : vector<16x16xf32>
    %158 = arith.addf %152, %157 : vector<16x16xf32>
    %c1_44 = arith.constant 1 : index
    %c1_45 = arith.constant 1 : index
    %159 = memref.load %arg6[%c1_44, %c1_45] : memref<4x4xf32, #tpu.memory_space<smem>>
    %160 = vector.extract_strided_slice %5 {offsets = [1, 0, 0], sizes = [1, 16, 16], strides = [1, 1, 1]} : vector<4x16x16xf32> to vector<1x16x16xf32>
    %161 = vector.shape_cast %160 : vector<1x16x16xf32> to vector<16x16xf32>
    %162 = vector.broadcast %159 : f32 to vector<16x16xf32>
    %163 = arith.mulf %162, %161 : vector<16x16xf32>
    %164 = arith.addf %158, %163 : vector<16x16xf32>
    %c2_46 = arith.constant 2 : index
    %c1_47 = arith.constant 1 : index
    %165 = memref.load %arg6[%c2_46, %c1_47] : memref<4x4xf32, #tpu.memory_space<smem>>
    %166 = vector.extract_strided_slice %5 {offsets = [2, 0, 0], sizes = [1, 16, 16], strides = [1, 1, 1]} : vector<4x16x16xf32> to vector<1x16x16xf32>
    %167 = vector.shape_cast %166 : vector<1x16x16xf32> to vector<16x16xf32>
    %168 = vector.broadcast %165 : f32 to vector<16x16xf32>
    %169 = arith.mulf %168, %167 : vector<16x16xf32>
    %170 = arith.addf %164, %169 : vector<16x16xf32>
    %c3_48 = arith.constant 3 : index
    %c1_49 = arith.constant 1 : index
    %171 = memref.load %arg6[%c3_48, %c1_49] : memref<4x4xf32, #tpu.memory_space<smem>>
    %172 = vector.extract_strided_slice %5 {offsets = [3, 0, 0], sizes = [1, 16, 16], strides = [1, 1, 1]} : vector<4x16x16xf32> to vector<1x16x16xf32>
    %173 = vector.shape_cast %172 : vector<1x16x16xf32> to vector<16x16xf32>
    %174 = vector.broadcast %171 : f32 to vector<16x16xf32>
    %175 = arith.mulf %174, %173 : vector<16x16xf32>
    %176 = arith.addf %170, %175 : vector<16x16xf32>
    %177 = vector.extract_strided_slice %3 {offsets = [1, 0, 0], sizes = [1, 16, 16], strides = [1, 1, 1]} : vector<4x16x16xf32> to vector<1x16x16xf32>
    %178 = vector.shape_cast %177 : vector<1x16x16xf32> to vector<16x16xf32>
    %179 = arith.addf %178, %150 : vector<16x16xf32>
    %cst_50 = arith.constant 0.000000e+00 : f32
    %180 = vector.broadcast %cst_50 : f32 to vector<16x16xf32>
    %181 = arith.maximumf %176, %180 : vector<16x16xf32>
    %182 = arith.addf %179, %181 : vector<16x16xf32>
    %183 = vector.extract_strided_slice %1 {offsets = [2, 0, 0], sizes = [1, 1, 8], strides = [1, 1, 1]} : vector<4x8x8xf32> to vector<1x1x8xf32>
    %184 = vector.shape_cast %183 : vector<1x1x8xf32> to vector<1x8xf32>
    %185 = vector.broadcast %8 : vector<16x1xf32> to vector<16x8xf32>
    %186 = vector.broadcast %184 : vector<1x8xf32> to vector<16x8xf32>
    %187 = arith.mulf %185, %186 : vector<16x8xf32>
    %188 = vector.extract_strided_slice %1 {offsets = [2, 1, 0], sizes = [1, 1, 8], strides = [1, 1, 1]} : vector<4x8x8xf32> to vector<1x1x8xf32>
    %189 = vector.shape_cast %188 : vector<1x1x8xf32> to vector<1x8xf32>
    %190 = vector.broadcast %10 : vector<16x1xf32> to vector<16x8xf32>
    %191 = vector.broadcast %189 : vector<1x8xf32> to vector<16x8xf32>
    %192 = arith.mulf %190, %191 : vector<16x8xf32>
    %193 = arith.addf %187, %192 : vector<16x8xf32>
    %194 = vector.extract_strided_slice %1 {offsets = [2, 2, 0], sizes = [1, 1, 8], strides = [1, 1, 1]} : vector<4x8x8xf32> to vector<1x1x8xf32>
    %195 = vector.shape_cast %194 : vector<1x1x8xf32> to vector<1x8xf32>
    %196 = vector.broadcast %12 : vector<16x1xf32> to vector<16x8xf32>
    %197 = vector.broadcast %195 : vector<1x8xf32> to vector<16x8xf32>
    %198 = arith.mulf %196, %197 : vector<16x8xf32>
    %199 = arith.addf %193, %198 : vector<16x8xf32>
    %200 = vector.extract_strided_slice %1 {offsets = [2, 3, 0], sizes = [1, 1, 8], strides = [1, 1, 1]} : vector<4x8x8xf32> to vector<1x1x8xf32>
    %201 = vector.shape_cast %200 : vector<1x1x8xf32> to vector<1x8xf32>
    %202 = vector.broadcast %14 : vector<16x1xf32> to vector<16x8xf32>
    %203 = vector.broadcast %201 : vector<1x8xf32> to vector<16x8xf32>
    %204 = arith.mulf %202, %203 : vector<16x8xf32>
    %205 = arith.addf %199, %204 : vector<16x8xf32>
    %206 = vector.extract_strided_slice %1 {offsets = [2, 4, 0], sizes = [1, 1, 8], strides = [1, 1, 1]} : vector<4x8x8xf32> to vector<1x1x8xf32>
    %207 = vector.shape_cast %206 : vector<1x1x8xf32> to vector<1x8xf32>
    %208 = vector.broadcast %16 : vector<16x1xf32> to vector<16x8xf32>
    %209 = vector.broadcast %207 : vector<1x8xf32> to vector<16x8xf32>
    %210 = arith.mulf %208, %209 : vector<16x8xf32>
    %211 = arith.addf %205, %210 : vector<16x8xf32>
    %212 = vector.extract_strided_slice %1 {offsets = [2, 5, 0], sizes = [1, 1, 8], strides = [1, 1, 1]} : vector<4x8x8xf32> to vector<1x1x8xf32>
    %213 = vector.shape_cast %212 : vector<1x1x8xf32> to vector<1x8xf32>
    %214 = vector.broadcast %18 : vector<16x1xf32> to vector<16x8xf32>
    %215 = vector.broadcast %213 : vector<1x8xf32> to vector<16x8xf32>
    %216 = arith.mulf %214, %215 : vector<16x8xf32>
    %217 = arith.addf %211, %216 : vector<16x8xf32>
    %218 = vector.extract_strided_slice %1 {offsets = [2, 6, 0], sizes = [1, 1, 8], strides = [1, 1, 1]} : vector<4x8x8xf32> to vector<1x1x8xf32>
    %219 = vector.shape_cast %218 : vector<1x1x8xf32> to vector<1x8xf32>
    %220 = vector.broadcast %20 : vector<16x1xf32> to vector<16x8xf32>
    %221 = vector.broadcast %219 : vector<1x8xf32> to vector<16x8xf32>
    %222 = arith.mulf %220, %221 : vector<16x8xf32>
    %223 = arith.addf %217, %222 : vector<16x8xf32>
    %224 = vector.extract_strided_slice %1 {offsets = [2, 7, 0], sizes = [1, 1, 8], strides = [1, 1, 1]} : vector<4x8x8xf32> to vector<1x1x8xf32>
    %225 = vector.shape_cast %224 : vector<1x1x8xf32> to vector<1x8xf32>
    %226 = vector.broadcast %22 : vector<16x1xf32> to vector<16x8xf32>
    %227 = vector.broadcast %225 : vector<1x8xf32> to vector<16x8xf32>
    %228 = arith.mulf %226, %227 : vector<16x8xf32>
    %229 = arith.addf %223, %228 : vector<16x8xf32>
    %cst_51 = arith.constant dense<0.000000e+00> : vector<16x16xf32>
    %230 = tpu.matmul %229, %6, %cst_51 {dimension_numbers = #tpu.dot_dimension_numbers<[1], [0], [0], [1], [0, 0, 1, 1], [], []>} : vector<16x8xf32>, vector<8x16xf32>, vector<16x16xf32> -> vector<16x16xf32>
    %c2_52 = arith.constant 2 : index
    %231 = memref.load %arg7[%c2_52] : memref<4xf32, #tpu.memory_space<smem>>
    %232 = vector.broadcast %231 : f32 to vector<16x16xf32>
    %c0_53 = arith.constant 0 : index
    %c2_54 = arith.constant 2 : index
    %233 = memref.load %arg6[%c0_53, %c2_54] : memref<4x4xf32, #tpu.memory_space<smem>>
    %234 = vector.extract_strided_slice %5 {offsets = [0, 0, 0], sizes = [1, 16, 16], strides = [1, 1, 1]} : vector<4x16x16xf32> to vector<1x16x16xf32>
    %235 = vector.shape_cast %234 : vector<1x16x16xf32> to vector<16x16xf32>
    %236 = vector.broadcast %233 : f32 to vector<16x16xf32>
    %237 = arith.mulf %236, %235 : vector<16x16xf32>
    %238 = arith.addf %232, %237 : vector<16x16xf32>
    %c1_55 = arith.constant 1 : index
    %c2_56 = arith.constant 2 : index
    %239 = memref.load %arg6[%c1_55, %c2_56] : memref<4x4xf32, #tpu.memory_space<smem>>
    %240 = vector.extract_strided_slice %5 {offsets = [1, 0, 0], sizes = [1, 16, 16], strides = [1, 1, 1]} : vector<4x16x16xf32> to vector<1x16x16xf32>
    %241 = vector.shape_cast %240 : vector<1x16x16xf32> to vector<16x16xf32>
    %242 = vector.broadcast %239 : f32 to vector<16x16xf32>
    %243 = arith.mulf %242, %241 : vector<16x16xf32>
    %244 = arith.addf %238, %243 : vector<16x16xf32>
    %c2_57 = arith.constant 2 : index
    %c2_58 = arith.constant 2 : index
    %245 = memref.load %arg6[%c2_57, %c2_58] : memref<4x4xf32, #tpu.memory_space<smem>>
    %246 = vector.extract_strided_slice %5 {offsets = [2, 0, 0], sizes = [1, 16, 16], strides = [1, 1, 1]} : vector<4x16x16xf32> to vector<1x16x16xf32>
    %247 = vector.shape_cast %246 : vector<1x16x16xf32> to vector<16x16xf32>
    %248 = vector.broadcast %245 : f32 to vector<16x16xf32>
    %249 = arith.mulf %248, %247 : vector<16x16xf32>
    %250 = arith.addf %244, %249 : vector<16x16xf32>
    %c3_59 = arith.constant 3 : index
    %c2_60 = arith.constant 2 : index
    %251 = memref.load %arg6[%c3_59, %c2_60] : memref<4x4xf32, #tpu.memory_space<smem>>
    %252 = vector.extract_strided_slice %5 {offsets = [3, 0, 0], sizes = [1, 16, 16], strides = [1, 1, 1]} : vector<4x16x16xf32> to vector<1x16x16xf32>
    %253 = vector.shape_cast %252 : vector<1x16x16xf32> to vector<16x16xf32>
    %254 = vector.broadcast %251 : f32 to vector<16x16xf32>
    %255 = arith.mulf %254, %253 : vector<16x16xf32>
    %256 = arith.addf %250, %255 : vector<16x16xf32>
    %257 = vector.extract_strided_slice %3 {offsets = [2, 0, 0], sizes = [1, 16, 16], strides = [1, 1, 1]} : vector<4x16x16xf32> to vector<1x16x16xf32>
    %258 = vector.shape_cast %257 : vector<1x16x16xf32> to vector<16x16xf32>
    %259 = arith.addf %258, %230 : vector<16x16xf32>
    %cst_61 = arith.constant 0.000000e+00 : f32
    %260 = vector.broadcast %cst_61 : f32 to vector<16x16xf32>
    %261 = arith.maximumf %256, %260 : vector<16x16xf32>
    %262 = arith.addf %259, %261 : vector<16x16xf32>
    %263 = vector.extract_strided_slice %1 {offsets = [3, 0, 0], sizes = [1, 1, 8], strides = [1, 1, 1]} : vector<4x8x8xf32> to vector<1x1x8xf32>
    %264 = vector.shape_cast %263 : vector<1x1x8xf32> to vector<1x8xf32>
    %265 = vector.broadcast %8 : vector<16x1xf32> to vector<16x8xf32>
    %266 = vector.broadcast %264 : vector<1x8xf32> to vector<16x8xf32>
    %267 = arith.mulf %265, %266 : vector<16x8xf32>
    %268 = vector.extract_strided_slice %1 {offsets = [3, 1, 0], sizes = [1, 1, 8], strides = [1, 1, 1]} : vector<4x8x8xf32> to vector<1x1x8xf32>
    %269 = vector.shape_cast %268 : vector<1x1x8xf32> to vector<1x8xf32>
    %270 = vector.broadcast %10 : vector<16x1xf32> to vector<16x8xf32>
    %271 = vector.broadcast %269 : vector<1x8xf32> to vector<16x8xf32>
    %272 = arith.mulf %270, %271 : vector<16x8xf32>
    %273 = arith.addf %267, %272 : vector<16x8xf32>
    %274 = vector.extract_strided_slice %1 {offsets = [3, 2, 0], sizes = [1, 1, 8], strides = [1, 1, 1]} : vector<4x8x8xf32> to vector<1x1x8xf32>
    %275 = vector.shape_cast %274 : vector<1x1x8xf32> to vector<1x8xf32>
    %276 = vector.broadcast %12 : vector<16x1xf32> to vector<16x8xf32>
    %277 = vector.broadcast %275 : vector<1x8xf32> to vector<16x8xf32>
    %278 = arith.mulf %276, %277 : vector<16x8xf32>
    %279 = arith.addf %273, %278 : vector<16x8xf32>
    %280 = vector.extract_strided_slice %1 {offsets = [3, 3, 0], sizes = [1, 1, 8], strides = [1, 1, 1]} : vector<4x8x8xf32> to vector<1x1x8xf32>
    %281 = vector.shape_cast %280 : vector<1x1x8xf32> to vector<1x8xf32>
    %282 = vector.broadcast %14 : vector<16x1xf32> to vector<16x8xf32>
    %283 = vector.broadcast %281 : vector<1x8xf32> to vector<16x8xf32>
    %284 = arith.mulf %282, %283 : vector<16x8xf32>
    %285 = arith.addf %279, %284 : vector<16x8xf32>
    %286 = vector.extract_strided_slice %1 {offsets = [3, 4, 0], sizes = [1, 1, 8], strides = [1, 1, 1]} : vector<4x8x8xf32> to vector<1x1x8xf32>
    %287 = vector.shape_cast %286 : vector<1x1x8xf32> to vector<1x8xf32>
    %288 = vector.broadcast %16 : vector<16x1xf32> to vector<16x8xf32>
    %289 = vector.broadcast %287 : vector<1x8xf32> to vector<16x8xf32>
    %290 = arith.mulf %288, %289 : vector<16x8xf32>
    %291 = arith.addf %285, %290 : vector<16x8xf32>
    %292 = vector.extract_strided_slice %1 {offsets = [3, 5, 0], sizes = [1, 1, 8], strides = [1, 1, 1]} : vector<4x8x8xf32> to vector<1x1x8xf32>
    %293 = vector.shape_cast %292 : vector<1x1x8xf32> to vector<1x8xf32>
    %294 = vector.broadcast %18 : vector<16x1xf32> to vector<16x8xf32>
    %295 = vector.broadcast %293 : vector<1x8xf32> to vector<16x8xf32>
    %296 = arith.mulf %294, %295 : vector<16x8xf32>
    %297 = arith.addf %291, %296 : vector<16x8xf32>
    %298 = vector.extract_strided_slice %1 {offsets = [3, 6, 0], sizes = [1, 1, 8], strides = [1, 1, 1]} : vector<4x8x8xf32> to vector<1x1x8xf32>
    %299 = vector.shape_cast %298 : vector<1x1x8xf32> to vector<1x8xf32>
    %300 = vector.broadcast %20 : vector<16x1xf32> to vector<16x8xf32>
    %301 = vector.broadcast %299 : vector<1x8xf32> to vector<16x8xf32>
    %302 = arith.mulf %300, %301 : vector<16x8xf32>
    %303 = arith.addf %297, %302 : vector<16x8xf32>
    %304 = vector.extract_strided_slice %1 {offsets = [3, 7, 0], sizes = [1, 1, 8], strides = [1, 1, 1]} : vector<4x8x8xf32> to vector<1x1x8xf32>
    %305 = vector.shape_cast %304 : vector<1x1x8xf32> to vector<1x8xf32>
    %306 = vector.broadcast %22 : vector<16x1xf32> to vector<16x8xf32>
    %307 = vector.broadcast %305 : vector<1x8xf32> to vector<16x8xf32>
    %308 = arith.mulf %306, %307 : vector<16x8xf32>
    %309 = arith.addf %303, %308 : vector<16x8xf32>
    %cst_62 = arith.constant dense<0.000000e+00> : vector<16x16xf32>
    %310 = tpu.matmul %309, %6, %cst_62 {dimension_numbers = #tpu.dot_dimension_numbers<[1], [0], [0], [1], [0, 0, 1, 1], [], []>} : vector<16x8xf32>, vector<8x16xf32>, vector<16x16xf32> -> vector<16x16xf32>
    %c3_63 = arith.constant 3 : index
    %311 = memref.load %arg7[%c3_63] : memref<4xf32, #tpu.memory_space<smem>>
    %312 = vector.broadcast %311 : f32 to vector<16x16xf32>
    %c0_64 = arith.constant 0 : index
    %c3_65 = arith.constant 3 : index
    %313 = memref.load %arg6[%c0_64, %c3_65] : memref<4x4xf32, #tpu.memory_space<smem>>
    %314 = vector.extract_strided_slice %5 {offsets = [0, 0, 0], sizes = [1, 16, 16], strides = [1, 1, 1]} : vector<4x16x16xf32> to vector<1x16x16xf32>
    %315 = vector.shape_cast %314 : vector<1x16x16xf32> to vector<16x16xf32>
    %316 = vector.broadcast %313 : f32 to vector<16x16xf32>
    %317 = arith.mulf %316, %315 : vector<16x16xf32>
    %318 = arith.addf %312, %317 : vector<16x16xf32>
    %c1_66 = arith.constant 1 : index
    %c3_67 = arith.constant 3 : index
    %319 = memref.load %arg6[%c1_66, %c3_67] : memref<4x4xf32, #tpu.memory_space<smem>>
    %320 = vector.extract_strided_slice %5 {offsets = [1, 0, 0], sizes = [1, 16, 16], strides = [1, 1, 1]} : vector<4x16x16xf32> to vector<1x16x16xf32>
    %321 = vector.shape_cast %320 : vector<1x16x16xf32> to vector<16x16xf32>
    %322 = vector.broadcast %319 : f32 to vector<16x16xf32>
    %323 = arith.mulf %322, %321 : vector<16x16xf32>
    %324 = arith.addf %318, %323 : vector<16x16xf32>
    %c2_68 = arith.constant 2 : index
    %c3_69 = arith.constant 3 : index
    %325 = memref.load %arg6[%c2_68, %c3_69] : memref<4x4xf32, #tpu.memory_space<smem>>
    %326 = vector.extract_strided_slice %5 {offsets = [2, 0, 0], sizes = [1, 16, 16], strides = [1, 1, 1]} : vector<4x16x16xf32> to vector<1x16x16xf32>
    %327 = vector.shape_cast %326 : vector<1x16x16xf32> to vector<16x16xf32>
    %328 = vector.broadcast %325 : f32 to vector<16x16xf32>
    %329 = arith.mulf %328, %327 : vector<16x16xf32>
    %330 = arith.addf %324, %329 : vector<16x16xf32>
    %c3_70 = arith.constant 3 : index
    %c3_71 = arith.constant 3 : index
    %331 = memref.load %arg6[%c3_70, %c3_71] : memref<4x4xf32, #tpu.memory_space<smem>>
    %332 = vector.extract_strided_slice %5 {offsets = [3, 0, 0], sizes = [1, 16, 16], strides = [1, 1, 1]} : vector<4x16x16xf32> to vector<1x16x16xf32>
    %333 = vector.shape_cast %332 : vector<1x16x16xf32> to vector<16x16xf32>
    %334 = vector.broadcast %331 : f32 to vector<16x16xf32>
    %335 = arith.mulf %334, %333 : vector<16x16xf32>
    %336 = arith.addf %330, %335 : vector<16x16xf32>
    %337 = vector.extract_strided_slice %3 {offsets = [3, 0, 0], sizes = [1, 16, 16], strides = [1, 1, 1]} : vector<4x16x16xf32> to vector<1x16x16xf32>
    %338 = vector.shape_cast %337 : vector<1x16x16xf32> to vector<16x16xf32>
    %339 = arith.addf %338, %310 : vector<16x16xf32>
    %cst_72 = arith.constant 0.000000e+00 : f32
    %340 = vector.broadcast %cst_72 : f32 to vector<16x16xf32>
    %341 = arith.maximumf %336, %340 : vector<16x16xf32>
    %342 = arith.addf %339, %341 : vector<16x16xf32>
    %c0_73 = arith.constant 0 : index
    %343 = memref.load %arg10[%c0_73] : memref<8xf32, #tpu.memory_space<smem>>
    %344 = vector.broadcast %343 : f32 to vector<18x18xf32>
    %c0_74 = arith.constant 0 : index
    %c0_75 = arith.constant 0 : index
    %c0_76 = arith.constant 0 : index
    %c0_77 = arith.constant 0 : index
    %345 = vector.load %arg11[%c0_74, %c0_75, %c0_76, %c0_77] : memref<1x8x18x18xf32, #tpu.memory_space<vmem>>, vector<1x1x18x18xf32>
    %346 = vector.shape_cast %345 : vector<1x1x18x18xf32> to vector<18x18xf32>
    %347 = vector.shape_cast %344 : vector<18x18xf32> to vector<1x1x18x18xf32>
    tpu.vector_store %arg11[%c0_74, %c0_75, %c0_76, %c0_77], %347 {strides = array<i32>} : memref<1x8x18x18xf32, #tpu.memory_space<vmem>>, vector<1x1x18x18xf32>,
    %c0_78 = arith.constant 0 : index
    %348 = memref.load %arg9[%c0_78] : memref<8xf32, #tpu.memory_space<smem>>
    %349 = vector.broadcast %348 : f32 to vector<16x16xf32>
    %c0_79 = arith.constant 0 : index
    %c0_80 = arith.constant 0 : index
    %350 = memref.load %arg8[%c0_79, %c0_80] : memref<4x8xf32, #tpu.memory_space<smem>>
    %351 = vector.broadcast %350 : f32 to vector<16x16xf32>
    %352 = arith.mulf %351, %102 : vector<16x16xf32>
    %353 = arith.addf %349, %352 : vector<16x16xf32>
    %c1_81 = arith.constant 1 : index
    %c0_82 = arith.constant 0 : index
    %354 = memref.load %arg8[%c1_81, %c0_82] : memref<4x8xf32, #tpu.memory_space<smem>>
    %355 = vector.broadcast %354 : f32 to vector<16x16xf32>
    %356 = arith.mulf %355, %182 : vector<16x16xf32>
    %357 = arith.addf %353, %356 : vector<16x16xf32>
    %c2_83 = arith.constant 2 : index
    %c0_84 = arith.constant 0 : index
    %358 = memref.load %arg8[%c2_83, %c0_84] : memref<4x8xf32, #tpu.memory_space<smem>>
    %359 = vector.broadcast %358 : f32 to vector<16x16xf32>
    %360 = arith.mulf %359, %262 : vector<16x16xf32>
    %361 = arith.addf %357, %360 : vector<16x16xf32>
    %c3_85 = arith.constant 3 : index
    %c0_86 = arith.constant 0 : index
    %362 = memref.load %arg8[%c3_85, %c0_86] : memref<4x8xf32, #tpu.memory_space<smem>>
    %363 = vector.broadcast %362 : f32 to vector<16x16xf32>
    %364 = arith.mulf %363, %342 : vector<16x16xf32>
    %365 = arith.addf %361, %364 : vector<16x16xf32>
    %cst_87 = arith.constant 0.000000e+00 : f32
    %366 = vector.broadcast %cst_87 : f32 to vector<16x16xf32>
    %367 = arith.maximumf %365, %366 : vector<16x16xf32>
    %c0_88 = arith.constant 0 : index
    %c0_89 = arith.constant 0 : index
    %c1_90 = arith.constant 1 : index
    %c1_91 = arith.constant 1 : index
    %368 = vector.load %arg11[%c0_88, %c0_89, %c1_90, %c1_91] : memref<1x8x18x18xf32, #tpu.memory_space<vmem>>, vector<1x1x16x16xf32>
    %369 = vector.shape_cast %368 : vector<1x1x16x16xf32> to vector<16x16xf32>
    %370 = vector.shape_cast %367 : vector<16x16xf32> to vector<1x1x16x16xf32>
    tpu.vector_store %arg11[%c0_88, %c0_89, %c1_90, %c1_91], %370 {strides = array<i32>} : memref<1x8x18x18xf32, #tpu.memory_space<vmem>>, vector<1x1x16x16xf32>,
    %c1_92 = arith.constant 1 : index
    %371 = memref.load %arg10[%c1_92] : memref<8xf32, #tpu.memory_space<smem>>
    %372 = vector.broadcast %371 : f32 to vector<18x18xf32>
    %c0_93 = arith.constant 0 : index
    %c1_94 = arith.constant 1 : index
    %c0_95 = arith.constant 0 : index
    %c0_96 = arith.constant 0 : index
    %373 = vector.load %arg11[%c0_93, %c1_94, %c0_95, %c0_96] : memref<1x8x18x18xf32, #tpu.memory_space<vmem>>, vector<1x1x18x18xf32>
    %374 = vector.shape_cast %373 : vector<1x1x18x18xf32> to vector<18x18xf32>
    %375 = vector.shape_cast %372 : vector<18x18xf32> to vector<1x1x18x18xf32>
    tpu.vector_store %arg11[%c0_93, %c1_94, %c0_95, %c0_96], %375 {strides = array<i32>} : memref<1x8x18x18xf32, #tpu.memory_space<vmem>>, vector<1x1x18x18xf32>,
    %c1_97 = arith.constant 1 : index
    %376 = memref.load %arg9[%c1_97] : memref<8xf32, #tpu.memory_space<smem>>
    %377 = vector.broadcast %376 : f32 to vector<16x16xf32>
    %c0_98 = arith.constant 0 : index
    %c1_99 = arith.constant 1 : index
    %378 = memref.load %arg8[%c0_98, %c1_99] : memref<4x8xf32, #tpu.memory_space<smem>>
    %379 = vector.broadcast %378 : f32 to vector<16x16xf32>
    %380 = arith.mulf %379, %102 : vector<16x16xf32>
    %381 = arith.addf %377, %380 : vector<16x16xf32>
    %c1_100 = arith.constant 1 : index
    %c1_101 = arith.constant 1 : index
    %382 = memref.load %arg8[%c1_100, %c1_101] : memref<4x8xf32, #tpu.memory_space<smem>>
    %383 = vector.broadcast %382 : f32 to vector<16x16xf32>
    %384 = arith.mulf %383, %182 : vector<16x16xf32>
    %385 = arith.addf %381, %384 : vector<16x16xf32>
    %c2_102 = arith.constant 2 : index
    %c1_103 = arith.constant 1 : index
    %386 = memref.load %arg8[%c2_102, %c1_103] : memref<4x8xf32, #tpu.memory_space<smem>>
    %387 = vector.broadcast %386 : f32 to vector<16x16xf32>
    %388 = arith.mulf %387, %262 : vector<16x16xf32>
    %389 = arith.addf %385, %388 : vector<16x16xf32>
    %c3_104 = arith.constant 3 : index
    %c1_105 = arith.constant 1 : index
    %390 = memref.load %arg8[%c3_104, %c1_105] : memref<4x8xf32, #tpu.memory_space<smem>>
    %391 = vector.broadcast %390 : f32 to vector<16x16xf32>
    %392 = arith.mulf %391, %342 : vector<16x16xf32>
    %393 = arith.addf %389, %392 : vector<16x16xf32>
    %cst_106 = arith.constant 0.000000e+00 : f32
    %394 = vector.broadcast %cst_106 : f32 to vector<16x16xf32>
    %395 = arith.maximumf %393, %394 : vector<16x16xf32>
    %c0_107 = arith.constant 0 : index
    %c1_108 = arith.constant 1 : index
    %c1_109 = arith.constant 1 : index
    %c1_110 = arith.constant 1 : index
    %396 = vector.load %arg11[%c0_107, %c1_108, %c1_109, %c1_110] : memref<1x8x18x18xf32, #tpu.memory_space<vmem>>, vector<1x1x16x16xf32>
    %397 = vector.shape_cast %396 : vector<1x1x16x16xf32> to vector<16x16xf32>
    %398 = vector.shape_cast %395 : vector<16x16xf32> to vector<1x1x16x16xf32>
    tpu.vector_store %arg11[%c0_107, %c1_108, %c1_109, %c1_110], %398 {strides = array<i32>} : memref<1x8x18x18xf32, #tpu.memory_space<vmem>>, vector<1x1x16x16xf32>,
    %c2_111 = arith.constant 2 : index
    %399 = memref.load %arg10[%c2_111] : memref<8xf32, #tpu.memory_space<smem>>
    %400 = vector.broadcast %399 : f32 to vector<18x18xf32>
    %c0_112 = arith.constant 0 : index
    %c2_113 = arith.constant 2 : index
    %c0_114 = arith.constant 0 : index
    %c0_115 = arith.constant 0 : index
    %401 = vector.load %arg11[%c0_112, %c2_113, %c0_114, %c0_115] : memref<1x8x18x18xf32, #tpu.memory_space<vmem>>, vector<1x1x18x18xf32>
    %402 = vector.shape_cast %401 : vector<1x1x18x18xf32> to vector<18x18xf32>
    %403 = vector.shape_cast %400 : vector<18x18xf32> to vector<1x1x18x18xf32>
    tpu.vector_store %arg11[%c0_112, %c2_113, %c0_114, %c0_115], %403 {strides = array<i32>} : memref<1x8x18x18xf32, #tpu.memory_space<vmem>>, vector<1x1x18x18xf32>,
    %c2_116 = arith.constant 2 : index
    %404 = memref.load %arg9[%c2_116] : memref<8xf32, #tpu.memory_space<smem>>
    %405 = vector.broadcast %404 : f32 to vector<16x16xf32>
    %c0_117 = arith.constant 0 : index
    %c2_118 = arith.constant 2 : index
    %406 = memref.load %arg8[%c0_117, %c2_118] : memref<4x8xf32, #tpu.memory_space<smem>>
    %407 = vector.broadcast %406 : f32 to vector<16x16xf32>
    %408 = arith.mulf %407, %102 : vector<16x16xf32>
    %409 = arith.addf %405, %408 : vector<16x16xf32>
    %c1_119 = arith.constant 1 : index
    %c2_120 = arith.constant 2 : index
    %410 = memref.load %arg8[%c1_119, %c2_120] : memref<4x8xf32, #tpu.memory_space<smem>>
    %411 = vector.broadcast %410 : f32 to vector<16x16xf32>
    %412 = arith.mulf %411, %182 : vector<16x16xf32>
    %413 = arith.addf %409, %412 : vector<16x16xf32>
    %c2_121 = arith.constant 2 : index
    %c2_122 = arith.constant 2 : index
    %414 = memref.load %arg8[%c2_121, %c2_122] : memref<4x8xf32, #tpu.memory_space<smem>>
    %415 = vector.broadcast %414 : f32 to vector<16x16xf32>
    %416 = arith.mulf %415, %262 : vector<16x16xf32>
    %417 = arith.addf %413, %416 : vector<16x16xf32>
    %c3_123 = arith.constant 3 : index
    %c2_124 = arith.constant 2 : index
    %418 = memref.load %arg8[%c3_123, %c2_124] : memref<4x8xf32, #tpu.memory_space<smem>>
    %419 = vector.broadcast %418 : f32 to vector<16x16xf32>
    %420 = arith.mulf %419, %342 : vector<16x16xf32>
    %421 = arith.addf %417, %420 : vector<16x16xf32>
    %cst_125 = arith.constant 0.000000e+00 : f32
    %422 = vector.broadcast %cst_125 : f32 to vector<16x16xf32>
    %423 = arith.maximumf %421, %422 : vector<16x16xf32>
    %c0_126 = arith.constant 0 : index
    %c2_127 = arith.constant 2 : index
    %c1_128 = arith.constant 1 : index
    %c1_129 = arith.constant 1 : index
    %424 = vector.load %arg11[%c0_126, %c2_127, %c1_128, %c1_129] : memref<1x8x18x18xf32, #tpu.memory_space<vmem>>, vector<1x1x16x16xf32>
    %425 = vector.shape_cast %424 : vector<1x1x16x16xf32> to vector<16x16xf32>
    %426 = vector.shape_cast %423 : vector<16x16xf32> to vector<1x1x16x16xf32>
    tpu.vector_store %arg11[%c0_126, %c2_127, %c1_128, %c1_129], %426 {strides = array<i32>} : memref<1x8x18x18xf32, #tpu.memory_space<vmem>>, vector<1x1x16x16xf32>,
    %c3_130 = arith.constant 3 : index
    %427 = memref.load %arg10[%c3_130] : memref<8xf32, #tpu.memory_space<smem>>
    %428 = vector.broadcast %427 : f32 to vector<18x18xf32>
    %c0_131 = arith.constant 0 : index
    %c3_132 = arith.constant 3 : index
    %c0_133 = arith.constant 0 : index
    %c0_134 = arith.constant 0 : index
    %429 = vector.load %arg11[%c0_131, %c3_132, %c0_133, %c0_134] : memref<1x8x18x18xf32, #tpu.memory_space<vmem>>, vector<1x1x18x18xf32>
    %430 = vector.shape_cast %429 : vector<1x1x18x18xf32> to vector<18x18xf32>
    %431 = vector.shape_cast %428 : vector<18x18xf32> to vector<1x1x18x18xf32>
    tpu.vector_store %arg11[%c0_131, %c3_132, %c0_133, %c0_134], %431 {strides = array<i32>} : memref<1x8x18x18xf32, #tpu.memory_space<vmem>>, vector<1x1x18x18xf32>,
    %c3_135 = arith.constant 3 : index
    %432 = memref.load %arg9[%c3_135] : memref<8xf32, #tpu.memory_space<smem>>
    %433 = vector.broadcast %432 : f32 to vector<16x16xf32>
    %c0_136 = arith.constant 0 : index
    %c3_137 = arith.constant 3 : index
    %434 = memref.load %arg8[%c0_136, %c3_137] : memref<4x8xf32, #tpu.memory_space<smem>>
    %435 = vector.broadcast %434 : f32 to vector<16x16xf32>
    %436 = arith.mulf %435, %102 : vector<16x16xf32>
    %437 = arith.addf %433, %436 : vector<16x16xf32>
    %c1_138 = arith.constant 1 : index
    %c3_139 = arith.constant 3 : index
    %438 = memref.load %arg8[%c1_138, %c3_139] : memref<4x8xf32, #tpu.memory_space<smem>>
    %439 = vector.broadcast %438 : f32 to vector<16x16xf32>
    %440 = arith.mulf %439, %182 : vector<16x16xf32>
    %441 = arith.addf %437, %440 : vector<16x16xf32>
    %c2_140 = arith.constant 2 : index
    %c3_141 = arith.constant 3 : index
    %442 = memref.load %arg8[%c2_140, %c3_141] : memref<4x8xf32, #tpu.memory_space<smem>>
    %443 = vector.broadcast %442 : f32 to vector<16x16xf32>
    %444 = arith.mulf %443, %262 : vector<16x16xf32>
    %445 = arith.addf %441, %444 : vector<16x16xf32>
    %c3_142 = arith.constant 3 : index
    %c3_143 = arith.constant 3 : index
    %446 = memref.load %arg8[%c3_142, %c3_143] : memref<4x8xf32, #tpu.memory_space<smem>>
    %447 = vector.broadcast %446 : f32 to vector<16x16xf32>
    %448 = arith.mulf %447, %342 : vector<16x16xf32>
    %449 = arith.addf %445, %448 : vector<16x16xf32>
    %cst_144 = arith.constant 0.000000e+00 : f32
    %450 = vector.broadcast %cst_144 : f32 to vector<16x16xf32>
    %451 = arith.maximumf %449, %450 : vector<16x16xf32>
    %c0_145 = arith.constant 0 : index
    %c3_146 = arith.constant 3 : index
    %c1_147 = arith.constant 1 : index
    %c1_148 = arith.constant 1 : index
    %452 = vector.load %arg11[%c0_145, %c3_146, %c1_147, %c1_148] : memref<1x8x18x18xf32, #tpu.memory_space<vmem>>, vector<1x1x16x16xf32>
    %453 = vector.shape_cast %452 : vector<1x1x16x16xf32> to vector<16x16xf32>
    %454 = vector.shape_cast %451 : vector<16x16xf32> to vector<1x1x16x16xf32>
    tpu.vector_store %arg11[%c0_145, %c3_146, %c1_147, %c1_148], %454 {strides = array<i32>} : memref<1x8x18x18xf32, #tpu.memory_space<vmem>>, vector<1x1x16x16xf32>,
    %c4_149 = arith.constant 4 : index
    %455 = memref.load %arg10[%c4_149] : memref<8xf32, #tpu.memory_space<smem>>
    %456 = vector.broadcast %455 : f32 to vector<18x18xf32>
    %c0_150 = arith.constant 0 : index
    %c4_151 = arith.constant 4 : index
    %c0_152 = arith.constant 0 : index
    %c0_153 = arith.constant 0 : index
    %457 = vector.load %arg11[%c0_150, %c4_151, %c0_152, %c0_153] : memref<1x8x18x18xf32, #tpu.memory_space<vmem>>, vector<1x1x18x18xf32>
    %458 = vector.shape_cast %457 : vector<1x1x18x18xf32> to vector<18x18xf32>
    %459 = vector.shape_cast %456 : vector<18x18xf32> to vector<1x1x18x18xf32>
    tpu.vector_store %arg11[%c0_150, %c4_151, %c0_152, %c0_153], %459 {strides = array<i32>} : memref<1x8x18x18xf32, #tpu.memory_space<vmem>>, vector<1x1x18x18xf32>,
    %c4_154 = arith.constant 4 : index
    %460 = memref.load %arg9[%c4_154] : memref<8xf32, #tpu.memory_space<smem>>
    %461 = vector.broadcast %460 : f32 to vector<16x16xf32>
    %c0_155 = arith.constant 0 : index
    %c4_156 = arith.constant 4 : index
    %462 = memref.load %arg8[%c0_155, %c4_156] : memref<4x8xf32, #tpu.memory_space<smem>>
    %463 = vector.broadcast %462 : f32 to vector<16x16xf32>
    %464 = arith.mulf %463, %102 : vector<16x16xf32>
    %465 = arith.addf %461, %464 : vector<16x16xf32>
    %c1_157 = arith.constant 1 : index
    %c4_158 = arith.constant 4 : index
    %466 = memref.load %arg8[%c1_157, %c4_158] : memref<4x8xf32, #tpu.memory_space<smem>>
    %467 = vector.broadcast %466 : f32 to vector<16x16xf32>
    %468 = arith.mulf %467, %182 : vector<16x16xf32>
    %469 = arith.addf %465, %468 : vector<16x16xf32>
    %c2_159 = arith.constant 2 : index
    %c4_160 = arith.constant 4 : index
    %470 = memref.load %arg8[%c2_159, %c4_160] : memref<4x8xf32, #tpu.memory_space<smem>>
    %471 = vector.broadcast %470 : f32 to vector<16x16xf32>
    %472 = arith.mulf %471, %262 : vector<16x16xf32>
    %473 = arith.addf %469, %472 : vector<16x16xf32>
    %c3_161 = arith.constant 3 : index
    %c4_162 = arith.constant 4 : index
    %474 = memref.load %arg8[%c3_161, %c4_162] : memref<4x8xf32, #tpu.memory_space<smem>>
    %475 = vector.broadcast %474 : f32 to vector<16x16xf32>
    %476 = arith.mulf %475, %342 : vector<16x16xf32>
    %477 = arith.addf %473, %476 : vector<16x16xf32>
    %cst_163 = arith.constant 0.000000e+00 : f32
    %478 = vector.broadcast %cst_163 : f32 to vector<16x16xf32>
    %479 = arith.maximumf %477, %478 : vector<16x16xf32>
    %c0_164 = arith.constant 0 : index
    %c4_165 = arith.constant 4 : index
    %c1_166 = arith.constant 1 : index
    %c1_167 = arith.constant 1 : index
    %480 = vector.load %arg11[%c0_164, %c4_165, %c1_166, %c1_167] : memref<1x8x18x18xf32, #tpu.memory_space<vmem>>, vector<1x1x16x16xf32>
    %481 = vector.shape_cast %480 : vector<1x1x16x16xf32> to vector<16x16xf32>
    %482 = vector.shape_cast %479 : vector<16x16xf32> to vector<1x1x16x16xf32>
    tpu.vector_store %arg11[%c0_164, %c4_165, %c1_166, %c1_167], %482 {strides = array<i32>} : memref<1x8x18x18xf32, #tpu.memory_space<vmem>>, vector<1x1x16x16xf32>,
    %c5_168 = arith.constant 5 : index
    %483 = memref.load %arg10[%c5_168] : memref<8xf32, #tpu.memory_space<smem>>
    %484 = vector.broadcast %483 : f32 to vector<18x18xf32>
    %c0_169 = arith.constant 0 : index
    %c5_170 = arith.constant 5 : index
    %c0_171 = arith.constant 0 : index
    %c0_172 = arith.constant 0 : index
    %485 = vector.load %arg11[%c0_169, %c5_170, %c0_171, %c0_172] : memref<1x8x18x18xf32, #tpu.memory_space<vmem>>, vector<1x1x18x18xf32>
    %486 = vector.shape_cast %485 : vector<1x1x18x18xf32> to vector<18x18xf32>
    %487 = vector.shape_cast %484 : vector<18x18xf32> to vector<1x1x18x18xf32>
    tpu.vector_store %arg11[%c0_169, %c5_170, %c0_171, %c0_172], %487 {strides = array<i32>} : memref<1x8x18x18xf32, #tpu.memory_space<vmem>>, vector<1x1x18x18xf32>,
    %c5_173 = arith.constant 5 : index
    %488 = memref.load %arg9[%c5_173] : memref<8xf32, #tpu.memory_space<smem>>
    %489 = vector.broadcast %488 : f32 to vector<16x16xf32>
    %c0_174 = arith.constant 0 : index
    %c5_175 = arith.constant 5 : index
    %490 = memref.load %arg8[%c0_174, %c5_175] : memref<4x8xf32, #tpu.memory_space<smem>>
    %491 = vector.broadcast %490 : f32 to vector<16x16xf32>
    %492 = arith.mulf %491, %102 : vector<16x16xf32>
    %493 = arith.addf %489, %492 : vector<16x16xf32>
    %c1_176 = arith.constant 1 : index
    %c5_177 = arith.constant 5 : index
    %494 = memref.load %arg8[%c1_176, %c5_177] : memref<4x8xf32, #tpu.memory_space<smem>>
    %495 = vector.broadcast %494 : f32 to vector<16x16xf32>
    %496 = arith.mulf %495, %182 : vector<16x16xf32>
    %497 = arith.addf %493, %496 : vector<16x16xf32>
    %c2_178 = arith.constant 2 : index
    %c5_179 = arith.constant 5 : index
    %498 = memref.load %arg8[%c2_178, %c5_179] : memref<4x8xf32, #tpu.memory_space<smem>>
    %499 = vector.broadcast %498 : f32 to vector<16x16xf32>
    %500 = arith.mulf %499, %262 : vector<16x16xf32>
    %501 = arith.addf %497, %500 : vector<16x16xf32>
    %c3_180 = arith.constant 3 : index
    %c5_181 = arith.constant 5 : index
    %502 = memref.load %arg8[%c3_180, %c5_181] : memref<4x8xf32, #tpu.memory_space<smem>>
    %503 = vector.broadcast %502 : f32 to vector<16x16xf32>
    %504 = arith.mulf %503, %342 : vector<16x16xf32>
    %505 = arith.addf %501, %504 : vector<16x16xf32>
    %cst_182 = arith.constant 0.000000e+00 : f32
    %506 = vector.broadcast %cst_182 : f32 to vector<16x16xf32>
    %507 = arith.maximumf %505, %506 : vector<16x16xf32>
    %c0_183 = arith.constant 0 : index
    %c5_184 = arith.constant 5 : index
    %c1_185 = arith.constant 1 : index
    %c1_186 = arith.constant 1 : index
    %508 = vector.load %arg11[%c0_183, %c5_184, %c1_185, %c1_186] : memref<1x8x18x18xf32, #tpu.memory_space<vmem>>, vector<1x1x16x16xf32>
    %509 = vector.shape_cast %508 : vector<1x1x16x16xf32> to vector<16x16xf32>
    %510 = vector.shape_cast %507 : vector<16x16xf32> to vector<1x1x16x16xf32>
    tpu.vector_store %arg11[%c0_183, %c5_184, %c1_185, %c1_186], %510 {strides = array<i32>} : memref<1x8x18x18xf32, #tpu.memory_space<vmem>>, vector<1x1x16x16xf32>,
    %c6_187 = arith.constant 6 : index
    %511 = memref.load %arg10[%c6_187] : memref<8xf32, #tpu.memory_space<smem>>
    %512 = vector.broadcast %511 : f32 to vector<18x18xf32>
    %c0_188 = arith.constant 0 : index
    %c6_189 = arith.constant 6 : index
    %c0_190 = arith.constant 0 : index
    %c0_191 = arith.constant 0 : index
    %513 = vector.load %arg11[%c0_188, %c6_189, %c0_190, %c0_191] : memref<1x8x18x18xf32, #tpu.memory_space<vmem>>, vector<1x1x18x18xf32>
    %514 = vector.shape_cast %513 : vector<1x1x18x18xf32> to vector<18x18xf32>
    %515 = vector.shape_cast %512 : vector<18x18xf32> to vector<1x1x18x18xf32>
    tpu.vector_store %arg11[%c0_188, %c6_189, %c0_190, %c0_191], %515 {strides = array<i32>} : memref<1x8x18x18xf32, #tpu.memory_space<vmem>>, vector<1x1x18x18xf32>,
    %c6_192 = arith.constant 6 : index
    %516 = memref.load %arg9[%c6_192] : memref<8xf32, #tpu.memory_space<smem>>
    %517 = vector.broadcast %516 : f32 to vector<16x16xf32>
    %c0_193 = arith.constant 0 : index
    %c6_194 = arith.constant 6 : index
    %518 = memref.load %arg8[%c0_193, %c6_194] : memref<4x8xf32, #tpu.memory_space<smem>>
    %519 = vector.broadcast %518 : f32 to vector<16x16xf32>
    %520 = arith.mulf %519, %102 : vector<16x16xf32>
    %521 = arith.addf %517, %520 : vector<16x16xf32>
    %c1_195 = arith.constant 1 : index
    %c6_196 = arith.constant 6 : index
    %522 = memref.load %arg8[%c1_195, %c6_196] : memref<4x8xf32, #tpu.memory_space<smem>>
    %523 = vector.broadcast %522 : f32 to vector<16x16xf32>
    %524 = arith.mulf %523, %182 : vector<16x16xf32>
    %525 = arith.addf %521, %524 : vector<16x16xf32>
    %c2_197 = arith.constant 2 : index
    %c6_198 = arith.constant 6 : index
    %526 = memref.load %arg8[%c2_197, %c6_198] : memref<4x8xf32, #tpu.memory_space<smem>>
    %527 = vector.broadcast %526 : f32 to vector<16x16xf32>
    %528 = arith.mulf %527, %262 : vector<16x16xf32>
    %529 = arith.addf %525, %528 : vector<16x16xf32>
    %c3_199 = arith.constant 3 : index
    %c6_200 = arith.constant 6 : index
    %530 = memref.load %arg8[%c3_199, %c6_200] : memref<4x8xf32, #tpu.memory_space<smem>>
    %531 = vector.broadcast %530 : f32 to vector<16x16xf32>
    %532 = arith.mulf %531, %342 : vector<16x16xf32>
    %533 = arith.addf %529, %532 : vector<16x16xf32>
    %cst_201 = arith.constant 0.000000e+00 : f32
    %534 = vector.broadcast %cst_201 : f32 to vector<16x16xf32>
    %535 = arith.maximumf %533, %534 : vector<16x16xf32>
    %c0_202 = arith.constant 0 : index
    %c6_203 = arith.constant 6 : index
    %c1_204 = arith.constant 1 : index
    %c1_205 = arith.constant 1 : index
    %536 = vector.load %arg11[%c0_202, %c6_203, %c1_204, %c1_205] : memref<1x8x18x18xf32, #tpu.memory_space<vmem>>, vector<1x1x16x16xf32>
    %537 = vector.shape_cast %536 : vector<1x1x16x16xf32> to vector<16x16xf32>
    %538 = vector.shape_cast %535 : vector<16x16xf32> to vector<1x1x16x16xf32>
    tpu.vector_store %arg11[%c0_202, %c6_203, %c1_204, %c1_205], %538 {strides = array<i32>} : memref<1x8x18x18xf32, #tpu.memory_space<vmem>>, vector<1x1x16x16xf32>,
    %c7_206 = arith.constant 7 : index
    %539 = memref.load %arg10[%c7_206] : memref<8xf32, #tpu.memory_space<smem>>
    %540 = vector.broadcast %539 : f32 to vector<18x18xf32>
    %c0_207 = arith.constant 0 : index
    %c7_208 = arith.constant 7 : index
    %c0_209 = arith.constant 0 : index
    %c0_210 = arith.constant 0 : index
    %541 = vector.load %arg11[%c0_207, %c7_208, %c0_209, %c0_210] : memref<1x8x18x18xf32, #tpu.memory_space<vmem>>, vector<1x1x18x18xf32>
    %542 = vector.shape_cast %541 : vector<1x1x18x18xf32> to vector<18x18xf32>
    %543 = vector.shape_cast %540 : vector<18x18xf32> to vector<1x1x18x18xf32>
    tpu.vector_store %arg11[%c0_207, %c7_208, %c0_209, %c0_210], %543 {strides = array<i32>} : memref<1x8x18x18xf32, #tpu.memory_space<vmem>>, vector<1x1x18x18xf32>,
    %c7_211 = arith.constant 7 : index
    %544 = memref.load %arg9[%c7_211] : memref<8xf32, #tpu.memory_space<smem>>
    %545 = vector.broadcast %544 : f32 to vector<16x16xf32>
    %c0_212 = arith.constant 0 : index
    %c7_213 = arith.constant 7 : index
    %546 = memref.load %arg8[%c0_212, %c7_213] : memref<4x8xf32, #tpu.memory_space<smem>>
    %547 = vector.broadcast %546 : f32 to vector<16x16xf32>
    %548 = arith.mulf %547, %102 : vector<16x16xf32>
    %549 = arith.addf %545, %548 : vector<16x16xf32>
    %c1_214 = arith.constant 1 : index
    %c7_215 = arith.constant 7 : index
    %550 = memref.load %arg8[%c1_214, %c7_215] : memref<4x8xf32, #tpu.memory_space<smem>>
    %551 = vector.broadcast %550 : f32 to vector<16x16xf32>
    %552 = arith.mulf %551, %182 : vector<16x16xf32>
    %553 = arith.addf %549, %552 : vector<16x16xf32>
    %c2_216 = arith.constant 2 : index
    %c7_217 = arith.constant 7 : index
    %554 = memref.load %arg8[%c2_216, %c7_217] : memref<4x8xf32, #tpu.memory_space<smem>>
    %555 = vector.broadcast %554 : f32 to vector<16x16xf32>
    %556 = arith.mulf %555, %262 : vector<16x16xf32>
    %557 = arith.addf %553, %556 : vector<16x16xf32>
    %c3_218 = arith.constant 3 : index
    %c7_219 = arith.constant 7 : index
    %558 = memref.load %arg8[%c3_218, %c7_219] : memref<4x8xf32, #tpu.memory_space<smem>>
    %559 = vector.broadcast %558 : f32 to vector<16x16xf32>
    %560 = arith.mulf %559, %342 : vector<16x16xf32>
    %561 = arith.addf %557, %560 : vector<16x16xf32>
    %cst_220 = arith.constant 0.000000e+00 : f32
    %562 = vector.broadcast %cst_220 : f32 to vector<16x16xf32>
    %563 = arith.maximumf %561, %562 : vector<16x16xf32>
    %c0_221 = arith.constant 0 : index
    %c7_222 = arith.constant 7 : index
    %c1_223 = arith.constant 1 : index
    %c1_224 = arith.constant 1 : index
    %564 = vector.load %arg11[%c0_221, %c7_222, %c1_223, %c1_224] : memref<1x8x18x18xf32, #tpu.memory_space<vmem>>, vector<1x1x16x16xf32>
    %565 = vector.shape_cast %564 : vector<1x1x16x16xf32> to vector<16x16xf32>
    %566 = vector.shape_cast %563 : vector<16x16xf32> to vector<1x1x16x16xf32>
    tpu.vector_store %arg11[%c0_221, %c7_222, %c1_223, %c1_224], %566 {strides = array<i32>} : memref<1x8x18x18xf32, #tpu.memory_space<vmem>>, vector<1x1x16x16xf32>,
    return
  }
  func.func @transform_0(%arg0: i32) -> (i32, i32, i32, i32) {
    %c0_i32 = arith.constant 0 : i32
    %c0_i32_0 = arith.constant 0 : i32
    %c0_i32_1 = arith.constant 0 : i32
    %c0_i32_2 = arith.constant 0 : i32
    return %arg0, %c0_i32, %c0_i32_0, %c0_i32_1 : i32, i32, i32, i32
  }
  func.func @transform_1(%arg0: i32) -> (i32, i32, i32, i32) {
    %c0_i32 = arith.constant 0 : i32
    %c0_i32_0 = arith.constant 0 : i32
    %c0_i32_1 = arith.constant 0 : i32
    %c0_i32_2 = arith.constant 0 : i32
    return %arg0, %c0_i32, %c0_i32_0, %c0_i32_1 : i32, i32, i32, i32
  }
  func.func @transform_2(%arg0: i32) -> (i32, i32, i32, i32) {
    %c0_i32 = arith.constant 0 : i32
    %c0_i32_0 = arith.constant 0 : i32
    %c0_i32_1 = arith.constant 0 : i32
    %c0_i32_2 = arith.constant 0 : i32
    return %arg0, %c0_i32, %c0_i32_0, %c0_i32_1 : i32, i32, i32, i32
  }
  func.func @transform_3(%arg0: i32) -> (i32, i32, i32) {
    %c0_i32 = arith.constant 0 : i32
    %c0_i32_0 = arith.constant 0 : i32
    %c0_i32_1 = arith.constant 0 : i32
    %c0_i32_2 = arith.constant 0 : i32
    return %c0_i32, %c0_i32_0, %c0_i32_1 : i32, i32, i32
  }
  func.func @transform_4(%arg0: i32) -> (i32, i32) {
    %c0_i32 = arith.constant 0 : i32
    %c0_i32_0 = arith.constant 0 : i32
    %c0_i32_1 = arith.constant 0 : i32
    return %c0_i32, %c0_i32_0 : i32, i32
  }
  func.func @transform_5(%arg0: i32) -> (i32, i32) {
    %c0_i32 = arith.constant 0 : i32
    %c0_i32_0 = arith.constant 0 : i32
    %c0_i32_1 = arith.constant 0 : i32
    return %c0_i32, %c0_i32_0 : i32, i32
  }
  func.func @transform_6(%arg0: i32) -> i32 {
    %c0_i32 = arith.constant 0 : i32
    %c0_i32_0 = arith.constant 0 : i32
    return %c0_i32 : i32
  }
  func.func @transform_7(%arg0: i32) -> (i32, i32) {
    %c0_i32 = arith.constant 0 : i32
    %c0_i32_0 = arith.constant 0 : i32
    %c0_i32_1 = arith.constant 0 : i32
    return %c0_i32, %c0_i32_0 : i32, i32
  }
  func.func @transform_8(%arg0: i32) -> i32 {
    %c0_i32 = arith.constant 0 : i32
    %c0_i32_0 = arith.constant 0 : i32
    return %c0_i32 : i32
  }
  func.func @transform_9(%arg0: i32) -> i32 {
    %c0_i32 = arith.constant 0 : i32
    %c0_i32_0 = arith.constant 0 : i32
    return %c0_i32 : i32
  }
  func.func @transform_10(%arg0: i32) -> (i32, i32, i32, i32) {
    %c0_i32 = arith.constant 0 : i32
    %c0_i32_0 = arith.constant 0 : i32
    %c0_i32_1 = arith.constant 0 : i32
    %c0_i32_2 = arith.constant 0 : i32
    return %arg0, %c0_i32, %c0_i32_0, %c0_i32_1 : i32, i32, i32, i32
  }
}

</mosaic_0001>

<bundles_post_ra>
// kernel: tpu_custom_call.1
= control target key start
LH: loop header
LB: loop body
LE: loop exit
PB: predicated region body
PF: predicated region fallthrough
CT: control target
= control target key end

     0   :  { %s3378_s0 = inlined_call_operand.hbm [shape: f32[2,4,8,8], index: 0, kind: input, shape index: {}]   ;;  %s3379_s1 = inlined_call_operand.vmem [shape: f32[2,4,16,16], index: 1, kind: input, shape index: {}]   ;;  %s3380_s2 = inlined_call_operand.hbm [shape: f32[2,4,16,16], index: 2, kind: input, shape index: {}]   ;;  %s3381_s3 = inlined_call_operand.vmem [shape: f32[8,16,1], index: 3, kind: input, shape index: {}]   ;;  %s3382_s4 = inlined_call_operand.vmem [shape: f32[8,16], index: 4, kind: input, shape index: {}]   ;;  %s3383_s5 = inlined_call_operand.vmem [shape: f32[4,4], index: 5, kind: input, shape index: {}]   ;;  %s3384_s6 = inlined_call_operand.vmem [shape: f32[4], index: 6, kind: input, shape index: {}]   ;;  %s3385_s7 = inlined_call_operand.vmem [shape: f32[4,8], index: 7, kind: input, shape index: {}]   ;;  %s3386_s8 = inlined_call_operand.vmem [shape: f32[8], index: 8, kind: input, shape index: {}]   ;;  %s3387_s9 = inlined_call_operand.vmem [shape: f32[8], index: 9, kind: input, shape index: {}]   ;;  %s3388_s10 = inlined_call_operand.vmem [shape: f32[2,8,18,18], index: 10, kind: output, shape index: {}]  }
   0x1   :  { %3435 = sst [smem:[#allocation46_spill]] %s3378_s0 }
   0x2   :  { %3436 = sst [smem:[#allocation47_spill]] %s3379_s1 }
   0x3   :  { %3437 = sst [smem:[#allocation48_spill]] %s3380_s2 }
   0x4   :  { %3438 = sst [smem:[#allocation49_spill]] %s3381_s3 }
   0x5   :  { %3439 = sst [smem:[#allocation50_spill]] %s3382_s4 }
   0x6   :  { %3440 = sst [smem:[#allocation51_spill]] %s3383_s5 }
   0x7   :  { %3441 = sst [smem:[#allocation52_spill]] %s3384_s6 }
   0x8   :  { %3442 = sst [smem:[#allocation53_spill]] %s3385_s7 }
   0x9   :  { %3443 = sst [smem:[#allocation54_spill]] %s3386_s8 }
   0xa   :  { %3444 = sst [smem:[#allocation55_spill]] %s3387_s9 }
   0xb   :  { %3445 = sst [smem:[#allocation56_spill]] %s3388_s10 }
   0xc   :  { %15 = vsyncpa [#allocation3], 0 }
   0xd   :  { %17 = vsyncpa [#allocation3 + $0x1], 0 }
   0xe   :  { %18 = vsyncpa [#allocation6], 0 }
   0xf   :  { %20 = vsyncpa [#allocation6 + $0x1], 0 }
  0x10   :  { %21 = vsyncpa [#allocation4], 0 }
  0x11   :  { %22 = vsyncpa [#allocation9], 0 }
  0x12   :  { %23 = vsyncpa [#allocation12], 0  ;;  %s2368_s13 = smov 0   ;;  %s2370_s14 = smov 0  }
  0x13   :  { %s2372_s15 = smov 0   ;;  %s2374_s16 = smov 0  }
  0x14 LB: > { %3446 = sst [smem:[#allocation19_spill]] %s2292_s14  ;;  %s2387_s17 = sadd.s32 4294967295, %s2300_s16   ;;  %s2300_s16 = sphi %s2374_s16, %s3532_s16   ;;  %s2296_s15 = sphi %s2372_s15, %s3535_s15   ;;  %s2292_s14 = sphi %s2370_s14, %s3534_s14   ;;  %s2288_s13 = sphi %s2368_s13, %s3533_s13  }
  0x15   : > { %3447 = sst [smem:[#allocation20_spill]] %s2296_s15  ;;  %p49_p0 = scmp.ne.s32.totalorder %s2292_s14, %s2288_s13 }
  0x16   : > { %p3389_p1 = scmp.eq.s32.totalorder %s2387_s17, 0  ;;  %p1836_p2 = scmp.ge.s32.totalorder %s2300_s16, 1 }
  0x17   : > { %p285_p3 = scmp.lt.s32.totalorder %s2300_s16, 3  ;;  %s3449_s6 = sld [smem:[#allocation52_spill]] }
  0x18   : > { %p2395_p4 = por %p3389_p1, %p49_p0  ;;  %s3451_s8 = sld [smem:[#allocation54_spill]] }
  0x19   : > { %p2402_p5 = pnand %p1836_p2, %p285_p3  ;;  %s3453_s5 = sld [smem:[#allocation51_spill]] }
  0x1a   : > { %s3448_s18 = scalar_select %p2395_p4, 1, 0 }
  0x1b   : > { %s3450_s22 = scalar_select %p2402_p5, 1, 0 }
  0x1c   : > { %p2042_p6 = pneg %p2402_p5  ;;  %s3454_s7 = sld [smem:[#allocation53_spill]] }
  0x1d   : > { %s315_s21 = sshll.u32 %s3449_s6, 4  ;;  %s316_s21 = int_to_ptr.vmem [resolvable:$true] %s315_s21 }
  0x1e   : > { %s337_s25 = sshll.u32 %s3451_s8, 4  ;;  %p2413_p7 = pnand %p2042_p6, %p3389_p1  ;;  %s338_s25 = int_to_ptr.vmem [resolvable:$true] %s337_s25 }
  0x1f   : > { %s304_s29 = sshll.u32 %s3453_s5, 4  ;;  %s2119_s13 = scalar_lea.vmem %s316_s21, 16  ;;  %s2420_s29 = int_to_ptr.vmem [resolvable:$true] %s304_s29 }
  0x20   : > { %p2120_p8 = scmp.ne.s32.totalorder %s316_s21, %s2119_s13  ;;  %p2427_p9 = pneg %p2413_p7 }
  0x21   : > { %p2127_p12 = scmp.lt.s32.totalorder %s316_s21, %s316_s21  ;;  %p2128_p13 = scmp.lt.s32.totalorder %s2119_s13, %s2119_s13 }
  0x22   : > { %s326_s12 = sshll.u32 %s3454_s7, 4  ;;  %p2122_p10 = pnand %p2427_p9, %p2120_p8  ;;  %s327_s12 = int_to_ptr.vmem [resolvable:$true] %s326_s12 }
  0x23   : > { %p2129_p0 = por %p2128_p13, %p2127_p12 }
  0x24   : > { %p2123_p11 = pneg %p2122_p10 }
  0x26   : > { %p2130_p2 = pnand %p2129_p0, %p2123_p11 }
  0x28   : > { %2133 = shalt.err (!%p2130_p2)
}
  0x29   : > { %s2302_s20 = smov [#allocation8]   ;;  %s2134_s23 = scalar_lea.vmem %s338_s25, 16 }
  0x2a   : > { %2048 = dma.vmem_to_smem (!%p2413_p7), %s316_s21, 16, %s2302_s20, [#allocation9]  }
  0x2b   : > { %p2135_p3 = scmp.ne.s32.totalorder %s338_s25, %s2134_s23  ;;  %p2142_p4 = scmp.lt.s32.totalorder %s338_s25, %s338_s25 }
  0x2c   : > { %p2143_p5 = scmp.lt.s32.totalorder %s2134_s23, %s2134_s23 }
  0x2d   : > { %p2137_p6 = pnand %p2135_p3, %p2427_p9 }
  0x2e   : > { %p2144_p8 = por %p2143_p5, %p2142_p4 }
  0x2f   : > { %p2138_p1 = pneg %p2137_p6 }
  0x31   : > { %p2145_p10 = pnand %p2144_p8, %p2138_p1 }
  0x33   : > { %2148 = shalt.err (!%p2145_p10)
}
  0x34   : > { %s2303_s24 = smov [#allocation11]   ;;  %s2149_s27 = scalar_lea.vmem %s2420_s29, 64 }
  0x35   : > { %2054 = dma.vmem_to_smem (!%p2413_p7), %s338_s25, 16, %s2303_s24, [#allocation12]  }
  0x36   : > { %p2150_p11 = scmp.ne.s32.totalorder %s2420_s29, %s2149_s27  ;;  %p2157_p0 = scmp.lt.s32.totalorder %s2420_s29, %s2420_s29 }
  0x37   : > { %p2158_p2 = scmp.lt.s32.totalorder %s2149_s27, %s2149_s27 }
  0x38   : > { %p2152_p12 = pnand %p2150_p11, %p2427_p9 }
  0x39   : > { %p2159_p3 = por %p2158_p2, %p2157_p0 }
  0x3a   : > { %p2153_p13 = pneg %p2152_p12 }
  0x3c   : > { %p2160_p4 = pnand %p2159_p3, %p2153_p13 }
  0x3e   : > { %2163 = shalt.err (!%p2160_p4)
}
  0x3f   : > { %s2304_s21 = smov [#allocation7]   ;;  %s2164_s25 = scalar_lea.vmem %s327_s12, 64 }
  0x40   : > { %2045 = dma.vmem_to_smem (!%p2413_p7), %s2420_s29, 64, %s2304_s21, [#allocation4]  }
  0x41   : > { %p2165_p1 = scmp.ne.s32.totalorder %s327_s12, %s2164_s25  ;;  %p2172_p8 = scmp.lt.s32.totalorder %s327_s12, %s327_s12 }
  0x42   : > { %p2173_p10 = scmp.lt.s32.totalorder %s2164_s25, %s2164_s25 }
  0x43   : > { %p2167_p5 = pnand %p2165_p1, %p2427_p9 }
  0x44   : > { %p2174_p11 = por %p2173_p10, %p2172_p8 }
  0x45   : > { %p2168_p6 = pneg %p2167_p5 }
  0x47   : > { %p2175_p12 = pnand %p2174_p11, %p2168_p6 }
  0x49   : > { %2178 = shalt.err (!%p2175_p12)
}
  0x4a   : > { %s2305_s11 = smov [#allocation10]   ;;  %s3456_s9 = sld [smem:[#allocation55_spill]] }
  0x4b   : > { %2051 = dma.vmem_to_smem (!%p2413_p7), %s327_s12, 64, %s2305_s11, [#allocation9]  }
  0x50   : > { %s348_s20 = sshll.u32 %s3456_s9, 4  ;;  %s349_s20 = int_to_ptr.vmem [resolvable:$true] %s348_s20 }
  0x51   : > { %s2179_s23 = scalar_lea.vmem %s349_s20, 16  ;;  %p2187_p3 = scmp.lt.s32.totalorder %s349_s20, %s349_s20 }
  0x52   : > { %p2180_p13 = scmp.ne.s32.totalorder %s349_s20, %s2179_s23  ;;  %p2188_p4 = scmp.lt.s32.totalorder %s2179_s23, %s2179_s23 }
  0x54   : > { %p2182_p0 = pnand %p2180_p13, %p2427_p9  ;;  %p2189_p1 = por %p2188_p4, %p2187_p3 }
  0x56   : > { %p2183_p2 = pneg %p2182_p0 }
  0x58   : > { %p2190_p5 = pnand %p2189_p1, %p2183_p2 }
  0x5a   : > { %2193 = shalt.err (!%p2190_p5)
}
  0x5b   : > { %s2306_s24 = smov [#allocation13]   ;;  %s2464_s12 = sadd.s32 1, %s2300_s16  }
  0x5c   : > { %2057 = dma.vmem_to_smem (!%p2413_p7), %s349_s20, 16, %s2306_s24, [#allocation12]  }
  0x5d   : > { %3457 = sst [smem:[#allocation21_spill]] %s2464_s12  ;;  %s33_s19 = ssub.s32 %s2300_s16, %s2464_s12 }
  0x5e   : > { %s36_s27 = sadd.s32 1, %s2296_s15  ;;  %p34_p9 = scmp.eq.s32.totalorder %s33_s19, 0 }
  0x5f   : > { %p43_p6 = scmp.ne.s32.totalorder %s2296_s15, %s2292_s14  ;;  %p44_p8 = scmp.eq.s32.totalorder %s2300_s16, 0 }
  0x60   : > { %p2070_p10 = scmp.lt.s32.totalorder %s2300_s16, 2  ;;  %s2477_s21 = sand.u32 1, %s2296_s15  }
  0x61   : > { %s2474_s26 = scalar_select %p34_p9, %s2296_s15, %s36_s27  }
  0x62   : > { %p45_p11 = por %p44_p8, %p43_p6  ;;  %s1843_s28 = sshll.u32 %s2477_s21, 5 }
  0x63   : > { %3458 = sst [smem:[#allocation22_spill]] %s2474_s26  ;;  %s1982_s30 = sshll.u32 %s2300_s16, 9 }
  0x64   : > { %s3459_s0 = sld [smem:[#allocation46_spill]]  ;;  %s363_s13 = scalar_lea.vmem [#allocation2], %s1843_s28 }
  0x65   : > { %s370_s20 = sshll.u32 %s363_s13, 4  ;;  %p2488_p7 = pnand %p2070_p10, %p45_p11  ;;  %s2486_s20 = int_to_ptr.vmem [resolvable:$true] %s370_s20 }
  0x67   : > { %p2196_p13 = pneg %p2488_p7 }
  0x6a   : > { %s2484_s29 = scalar_lea.hbm %s3459_s0, %s1982_s30  ;;  %s2199_s30 = scalar_lea.hbm %s3459_s0, 1024 }
  0x6b   : > { %s2194_s19 = scalar_lea.hbm %s2484_s29, 512  ;;  %p2200_p3 = scmp.lt.s32.totalorder %s2484_s29, %s3459_s0 }
  0x6c   : > { %p2195_p12 = scmp.ne.s32.totalorder %s2484_s29, %s2194_s19  ;;  %p2201_p4 = scmp.lt.s32.totalorder %s2199_s30, %s2194_s19 }
  0x6e   : > { %p2197_p0 = pnand %p2196_p13, %p2195_p12  ;;  %p2202_p1 = por %p2201_p4, %p2200_p3 }
  0x70   : > { %p2198_p2 = pneg %p2197_p0 }
  0x72   : > { %p2203_p5 = pnand %p2202_p1, %p2198_p2 }
  0x74   : > { %2206 = shalt.err (!%p2203_p5)
}
  0x75   : > { %s2207_s13 = scalar_lea.vmem %s2486_s20, 512  ;;  %s2307_s27 = smov [#allocation2]  }
  0x76   : > { %p2208_p9 = scmp.ne.s32.totalorder %s2486_s20, %s2207_s13  ;;  %s2212_s28 = sshll.u32 %s2307_s27, 4  ;;  %s2213_s28 = int_to_ptr.vmem [resolvable:$false] %s2212_s28 }
  0x77   : > { %s2214_s24 = scalar_lea.vmem %s2213_s28, 1024  ;;  %p2215_p10 = scmp.lt.s32.totalorder %s2486_s20, %s2213_s28 }
  0x78   : > { %p2210_p6 = pnand %p2208_p9, %p2196_p13  ;;  %p2216_p11 = scmp.lt.s32.totalorder %s2214_s24, %s2207_s13 }
  0x7a   : > { %p2211_p8 = pneg %p2210_p6  ;;  %p2217_p12 = por %p2216_p11, %p2215_p10 }
  0x7c   : > { %p2218_p0 = pnand %p2217_p12, %p2211_p8 }
  0x7e   : > { %2221 = shalt.err (!%p2218_p0)
}
  0x7f   : > { %s2308_s19 = smov 128   ;;  %s2309_s30 = smov 8  }
  0x80   : > { %s3461_s25 = scalar_lea.sflag [#allocation3], %s2477_s21  ;;  %s1846_s24 = sshll.u32 %s2477_s21, 6 }
  0x81   : > { %2061 = dma.hbm_to_vmem [thread:$0]  (!%p2488_p7), %s2484_s29, 512, %s2486_s20, %s3461_s25, %s2308_s19, %s2308_s19, %s2309_s30  }
  0x82   : > { %s1983_s11 = sshll.u32 %s2300_s16, 10  ;;  %s3462_s2 = sld [smem:[#allocation48_spill]] }
  0x83   : > { %s392_s0 = scalar_lea.vmem [#allocation5], %s1846_s24  ;;  %s389_s6 = scalar_lea.sflag [#allocation6], %s2477_s21 }
  0x84   : > { %s399_s5 = sshll.u32 %s392_s0, 4  ;;  %s2529_s5 = int_to_ptr.vmem [resolvable:$true] %s399_s5 }
  0x88   : > { %s2527_s28 = scalar_lea.hbm %s3462_s2, %s1983_s11  ;;  %s2227_s20 = scalar_lea.hbm %s3462_s2, 2048 }
  0x89   : > { %s2222_s7 = scalar_lea.hbm %s2527_s28, 1024  ;;  %p2228_p1 = scmp.lt.s32.totalorder %s2527_s28, %s3462_s2 }
  0x8a   : > { %p2223_p2 = scmp.ne.s32.totalorder %s2527_s28, %s2222_s7  ;;  %p2229_p5 = scmp.lt.s32.totalorder %s2227_s20, %s2222_s7 }
  0x8c   : > { %p2225_p3 = pnand %p2223_p2, %p2196_p13  ;;  %p2230_p9 = por %p2229_p5, %p2228_p1 }
  0x8e   : > { %p2226_p4 = pneg %p2225_p3 }
  0x90   : > { %p2231_p6 = pnand %p2230_p9, %p2226_p4 }
  0x92   : > { %2234 = shalt.err (!%p2231_p6)
}
  0x93   : > { %s2235_s0 = scalar_lea.vmem %s2529_s5, 1024  ;;  %s2310_s21 = smov [#allocation5]  }
  0x94   : > { %p2236_p8 = scmp.ne.s32.totalorder %s2529_s5, %s2235_s0  ;;  %s2240_s24 = sshll.u32 %s2310_s21, 4  ;;  %s2241_s24 = int_to_ptr.vmem [resolvable:$false] %s2240_s24 }
  0x95   : > { %s2242_s13 = scalar_lea.vmem %s2241_s24, 2048  ;;  %p2243_p12 = scmp.lt.s32.totalorder %s2529_s5, %s2241_s24 }
  0x96   : > { %p2238_p10 = pnand %p2236_p8, %p2196_p13  ;;  %p2244_p0 = scmp.lt.s32.totalorder %s2242_s13, %s2235_s0 }
  0x98   : > { %p2239_p11 = pneg %p2238_p10  ;;  %p2245_p2 = por %p2244_p0, %p2243_p12 }
  0x9a   : > { %p2246_p3 = pnand %p2245_p2, %p2239_p11 }
  0x9c   : > { %2249 = shalt.err (!%p2246_p3)
}
  0x9d   : > { %2064 = dma.hbm_to_vmem [thread:$0]  (!%p2488_p7), %s2527_s28, 1024, %s2529_s5, %s389_s6, %s2308_s19, %s2308_s19, %s2309_s30  }
  0x9e   : > { %p3463_p13 = scmp.ne.s32.totalorder %s3450_s22, 0 }
  0xa0   : > { %411 = sbr.rel (%p3463_p13) target bundleno = 709 (0x2c5), region = 60 }
  0xa5   : > { %s413_s7 = sand.u32 1, %s2292_s14   ;;  %p3464_p4 = scmp.ne.s32.totalorder %s3448_s18, 0 }
  0xa6   : > { %s1850_s27 = sshll.u32 %s413_s7, 5  ;;  %s414_s16 = scalar_lea.sflag [#allocation3], %s413_s7 }
  0xa7   : > { %s2560_s29 = scalar_lea.vmem [#allocation2], %s1850_s27 }
  0xa8   : > { %2267 = dma.done.wait (%p3464_p4), %s414_s16, 512  }
  0xa9   : > { %2269 = vsyncadd (%p3464_p4), %s414_s16, 4294966784  ;;  %s1851_s23 = sshll.u32 %s413_s7, 6  ;;  %s423_s20 = scalar_lea.sflag [#allocation6], %s413_s7 }
  0xaa   : > { %s2566_s25 = scalar_lea.vmem [#allocation5], %s1851_s23 }
  0xab   : > { %2271 = dma.done.wait (%p3464_p4), %s423_s20, 1024  }
  0xac   : > { %2273 = vsyncadd (%p3464_p4), %s423_s20, 4294966272  ;;  %p3465_p7 = scmp.eq.s32.totalorder %s2387_s17, 0 }
  0xae   : > { %2275 = dma.done.wait (%p3465_p7), [#allocation4], 64   ;;  %p3466_p1 = pmov %p3465_p7 }
  0xb0   : > { %2277 = vsyncadd (%p3466_p1), [#allocation4], 4294967232  ;;  %p3467_p5 = pmov %p3466_p1 }
  0xb1   : > { %p3468_p9 = pmov %p3466_p1 }
  0xb2   : > { %2279 = dma.done.wait (%p3467_p5), [#allocation9], 80  }
  0xb3   : > { %2281 = vsyncadd (%p3468_p9), [#allocation9], 4294967216  ;;  %p3469_p6 = pmov %p3466_p1 }
  0xb4   : > { %p3470_p8 = pmov %p3466_p1 }
  0xb5   : > { %2283 = dma.done.wait (%p3469_p6), [#allocation12], 32  }
  0xb6   : > { %2285 = vsyncadd (%p3470_p8), [#allocation12], 4294967264 }
  0xb7   : > { %451 = sfence }
  0xb8   : > { %s3471_s3 = sld [smem:[#allocation49_spill]]  ;;  %v2311_v2 = vmov 0   ;;  %v558_v18 = vlaneseq  ;;  %v504_v21 = vld [vmem:[%s2560_s29] sm:$0xff]  ;;  %v505_v22 = vld [vmem:[%s2560_s29 + $0x8] sm:$0xff]  ;;  %v506_v24 = vld [vmem:[%s2560_s29 + $0x10] sm:$0xff]  ;;  %vm690_vm0 = vcmask 64512  }
  0xb9   : > { %2118 = vset.pattern.permute.xlu1 %v2311_v2  ;;  %2117 = vset.pattern.permute.xlu0 %v2311_v2  ;;  %s3472_s4 = sld [smem:[#allocation50_spill]]  ;;  %v507_v25 = vld [vmem:[%s2560_s29 + $0x18] sm:$0xff]  ;;  %p494_p10 = scmp.lt.s32.totalorder %s2387_s17, 1  ;;  %vm1331_vm1 = vcmask 146432   ;;  %vm1334_vm2 = vcmask 140288   ;;  %vm1372_vm3 = vcmask 138248  }
  0xba   : > { %v559_v19 = vshrl.u32 %v558_v18, 7  ;;  %s1329_s5 = sld [smem:[#allocation13]] }
  0xbb   : > { %s3537_s17 = smov (!%p494_p10, %s2387_s17), 1  ;;  %s3475_s10 = sld [smem:[#allocation56_spill]] }
  0xbc   : > { %v560_v20 = vsub.s32 0, %v559_v19  ;;  %v576_v23 = vsub.s32 1, %v559_v19  ;;  %v594_v26 = vsub.s32 2, %v559_v19  ;;  %v612_v29 = vsub.s32 3, %v559_v19  ;;  %s2017_s29 = smul.u32 192, %s3537_s17  ;;  %s2753_s19 = sld [smem:[#allocation7]] }
  0xbd   : > { %v630_v33 = vsub.s32 4, %v559_v19  ;;  %v648_v37 = vsub.s32 5, %v559_v19  ;;  %v666_v41 = vsub.s32 6, %v559_v19  ;;  %v684_v47 = vsub.s32 7, %v559_v19  ;;  %s2755_s30 = sld [smem:[#allocation7 + $0x1]] }
  0xbe   : > { %v526_v0 = vld [vmem:[%s3471_s3 + $0x8] sm:$0xff]  ;;  %v525_v1 = vld [vmem:[%s3471_s3] sm:$0xff]  ;;  %v1861_v3 = vld [vmem:[%s3471_s3 + $0x18] sm:$0xff]  ;;  %v561_v27 = vrot.slane %v504_v21, %v560_v20  ;;  %v807_v28 = vrot.slane %v505_v22, %v560_v20  ;;  %v982_v30 = vrot.slane %v506_v24, %v560_v20  ;;  %v1157_v31 = vrot.slane %v507_v25, %v560_v20  ;;  %s2757_s28 = sld [smem:[#allocation8]] }
  0xbf   : > { %555 = vperm.xlu1 %2118, %v526_v0   ;;  %550 = vperm.xlu0 %2117, %v525_v1   ;;  %v1860_v4 = vld [vmem:[%s3471_s3 + $0x10] sm:$0xff]  ;;  %v1863_v5 = vld [vmem:[%s3471_s3 + $0x28] sm:$0xff]  ;;  %v1862_v6 = vld [vmem:[%s3471_s3 + $0x20] sm:$0xff]  ;;  %v577_v32 = vrot.slane %v504_v21, %v576_v23  ;;  %v813_v34 = vrot.slane %v505_v22, %v576_v23  ;;  %v988_v35 = vrot.slane %v506_v24, %v576_v23  ;;  %s2759_s11 = sld [smem:[#allocation7 + $0x80]] }
  0xc0   : > { %v1865_v7 = vld [vmem:[%s3471_s3 + $0x38] sm:$0xff]  ;;  %v1864_v8 = vld [vmem:[%s3471_s3 + $0x30] sm:$0xff]  ;;  %v1867_v9 = vld [vmem:[%s3471_s3 + $0x48] sm:$0xff]  ;;  %v1163_v36 = vrot.slane %v507_v25, %v576_v23  ;;  %v595_v38 = vrot.slane %v504_v21, %v594_v26  ;;  %v821_v39 = vrot.slane %v505_v22, %v594_v26  ;;  %v996_v40 = vrot.slane %v506_v24, %v594_v26  ;;  %s2761_s0 = sld [smem:[#allocation7 + $0x100]] }
  0xc1   : > { %v1866_v10 = vld [vmem:[%s3471_s3 + $0x40] sm:$0xff]  ;;  %v1869_v11 = vld [vmem:[%s3471_s3 + $0x58] sm:$0xff]  ;;  %v1868_v12 = vld [vmem:[%s3471_s3 + $0x50] sm:$0xff]  ;;  %v1171_v44 = vrot.slane %v507_v25, %v594_v26  ;;  %v2647_v45 = vrot.slane %v504_v21, %v612_v29  ;;  %v2649_v46 = vrot.slane %v505_v22, %v612_v29  ;;  %v2651_v48 = vrot.slane %v506_v24, %v612_v29  ;;  %s2745_s22 = scalar_lea.vmem %s3475_s10, %s2017_s29  ;;  %s2763_s21 = sld [smem:[#allocation8 + $0x1]] }
  0xc2   : > { %v1871_v13 = vld [vmem:[%s3471_s3 + $0x68] sm:$0xff]  ;;  %v1870_v14 = vld [vmem:[%s3471_s3 + $0x60] sm:$0xff]  ;;  %v1873_v15 = vld [vmem:[%s3471_s3 + $0x78] sm:$0xff]  ;;  %v2653_v49 = vrot.slane %v507_v25, %v612_v29  ;;  %v2655_v50 = vrot.slane %v504_v21, %v630_v33  ;;  %v2657_v51 = vrot.slane %v505_v22, %v630_v33  ;;  %v2659_v52 = vrot.slane %v506_v24, %v630_v33  ;;  %3476 = sst [smem:[#allocation24_spill]] %s2745_s22 }
  0xc3   : > { %571 = vperm.xlu1 %2118, %v1861_v3   ;;  %566 = vperm.xlu0 %2117, %v1860_v4   ;;  %v1872_v16 = vld [vmem:[%s3471_s3 + $0x70] sm:$0xff]  ;;  %v2635_v17 = vld [vmem:[%s3472_s4] sm:$0xff]  ;;  %v2661_v53 = vrot.slane %v507_v25, %v630_v33  ;;  %v2663_v54 = vrot.slane %v504_v21, %v648_v37  ;;  %v2665_v55 = vrot.slane %v505_v22, %v648_v37  ;;  %s2765_s24 = sld [smem:[#allocation7 + $0x180]] }
  0xc4   : > { %3473 = vst [vmem:[#allocation23_spill] sm:$0xff] %v2635_v17  ;;  %1997 = vmatprep.subr.mxu0 %v2635_v17  ;;  %2002 = vmatprep.subr.mxu1 %v2635_v17  ;;  %v2667_v56 = vrot.slane %v506_v24, %v648_v37  ;;  %v2669_v57 = vrot.slane %v507_v25, %v648_v37  ;;  %s2767_s13 = sld [smem:[#allocation7 + $0x81]] }
  0xc5   : > { %1998 = vmatpush3.msra.mxu0 %v2635_v17  ;;  %2003 = vmatpush3.msra.mxu1 %v2635_v17  ;;  %v2671_v58 = vrot.slane %v504_v21, %v666_v41  ;;  %v2673_v59 = vrot.slane %v505_v22, %v666_v41  ;;  %v2675_v62 = vrot.slane %v506_v24, %v666_v41  ;;  %s2769_s7 = sld [smem:[#allocation7 + $0x101]] }
  0xc6   : > { %2007 = vmatprep.subr.mxu0 %v2635_v17  ;;  %2012 = vmatprep.subr.mxu1 %v2635_v17  ;;  %v2677_v63 = vrot.slane %v507_v25, %v666_v41  ;;  %v2679_v0 = vrot.slane %v506_v24, %v684_v47  ;;  %v2681_v1 = vrot.slane %v507_v25, %v684_v47  ;;  %s2771_s27 = sld [smem:[#allocation7 + $0x181]] }
  0xc7   : > { %589 = vperm.xlu1 %2118, %v1863_v5   ;;  %584 = vperm.xlu0 %2117, %v1862_v6   ;;  %v2683_v4 = vrot.slane %v504_v21, %v684_v47  ;;  %v2685_v5 = vrot.slane %v505_v22, %v684_v47  ;;  %s2773_s16 = sld [smem:[#allocation8 + $0x2]] }
  0xc8   : > { %s2775_s23 = sld [smem:[#allocation7 + $0x2]] }
  0xc9   : > { %s2777_s20 = sld [smem:[#allocation7 + $0x82]] }
  0xca   : > { %s2779_s29 = sld [smem:[#allocation7 + $0x102]] }
  0xcb   : > { %607 = vperm.xlu1 %2118, %v1865_v7   ;;  %602 = vperm.xlu0 %2117, %v1864_v8   ;;  %s2783_s6 = sld [smem:[#allocation8 + $0x3]] }
  0xcc   : > { %s2785_s18 = sld [smem:[#allocation7 + $0x3]] }
  0xcd   : > { %s2787_s2 = sld [smem:[#allocation7 + $0x83]] }
  0xce   : > { %s2789_s3 = sld [smem:[#allocation7 + $0x103]] }
  0xcf   : > { %625 = vperm.xlu1 %2118, %v1867_v9   ;;  %620 = vperm.xlu0 %2117, %v1866_v10   ;;  %s2791_s4 = sld [smem:[#allocation7 + $0x183]] }
  0xd0   : > { %s2793_s8 = sld [smem:[#allocation11]] }
  0xd1   : > { %s2795_s9 = sld [smem:[#allocation10]] }
  0xd2   : > { %s2799_s10 = sld [smem:[#allocation10 + $0x80]] }
  0xd3   : > { %643 = vperm.xlu1 %2118, %v1869_v11   ;;  %638 = vperm.xlu0 %2117, %v1868_v12   ;;  %s2801_s26 = sld [smem:[#allocation10 + $0x100]] }
  0xd4   : > { %s2803_s15 = sld [smem:[#allocation10 + $0x180]] }
  0xd5   : > { %s2806_s14 = sld [smem:[#allocation11 + $0x1]] }
  0xd6   : > { %s2816_s12 = sld [smem:[#allocation10 + $0x81]] }
  0xd7   : > { %661 = vperm.xlu1 %2118, %v1871_v13   ;;  %656 = vperm.xlu0 %2117, %v1870_v14   ;;  %s2822_s1 = sld [smem:[#allocation10 + $0x181]] }
  0xd9   : > { %3477 = sst [smem:[#allocation25_spill]] %s2801_s26 }
  0xda   : > { %3478 = sst [smem:[#allocation26_spill]] %s2803_s15 }
  0xdb   : > { %679 = vperm.xlu1 %2118, %v1873_v15   ;;  %674 = vperm.xlu0 %2117, %v1872_v16  }
  0xdd   : > { %3480 = sst [smem:[#allocation28_spill]] %s2822_s1 }
 0x13a   : > { %v556_v42 = vpop.permute.xlu1 %555  ;;  %v551_v43 = vpop.permute.xlu0 %550 }
 0x13b   : > { %v563_v2 = vmul.f32 %v561_v27, %v556_v42  ;;  %v809_v3 = vmul.f32 %v807_v28, %v556_v42  ;;  %v984_v6 = vmul.f32 %v982_v30, %v556_v42  ;;  %v1159_v7 = vmul.f32 %v1157_v31, %v556_v42 }
 0x13c   : > { %v562_v10 = vmul.f32 %v561_v27, %v551_v43  ;;  %v808_v14 = vmul.f32 %v807_v28, %v551_v43  ;;  %v983_v15 = vmul.f32 %v982_v30, %v551_v43  ;;  %v1158_v23 = vmul.f32 %v1157_v31, %v551_v43 }
 0x13e   : > { %v572_v60 = vpop.permute.xlu1 %571  ;;  %v567_v61 = vpop.permute.xlu0 %566 }
 0x13f   : > { %v579_v8 = vmul.f32 %v577_v32, %v572_v60  ;;  %v815_v9 = vmul.f32 %v813_v34, %v572_v60  ;;  %v990_v11 = vmul.f32 %v988_v35, %v572_v60  ;;  %v1165_v12 = vmul.f32 %v1163_v36, %v572_v60 }
 0x140   : > { %v578_v13 = vmul.f32 %v577_v32, %v567_v61  ;;  %v814_v16 = vmul.f32 %v813_v34, %v567_v61  ;;  %v989_v18 = vmul.f32 %v988_v35, %v567_v61  ;;  %v1164_v24 = vmul.f32 %v1163_v36, %v567_v61 }
 0x141   : > { %v581_v22 = vadd.f32 %v579_v8, %v563_v2  ;;  %v817_v26 = vadd.f32 %v815_v9, %v809_v3  ;;  %v992_v37 = vadd.f32 %v990_v11, %v984_v6  ;;  %v1167_v41 = vadd.f32 %v1165_v12, %v1159_v7 }
 0x142   : > { %v590_v19 = vpop.permute.xlu1 %589  ;;  %v585_v20 = vpop.permute.xlu0 %584  ;;  %v580_v27 = vadd.f32 %v578_v13, %v562_v10  ;;  %v816_v47 = vadd.f32 %v814_v16, %v808_v14  ;;  %v991_v32 = vadd.f32 %v989_v18, %v983_v15  ;;  %v1166_v60 = vadd.f32 %v1164_v24, %v1158_v23 }
 0x143   : > { %v597_v21 = vmul.f32 %v595_v38, %v590_v19  ;;  %v823_v25 = vmul.f32 %v821_v39, %v590_v19  ;;  %v998_v29 = vmul.f32 %v996_v40, %v590_v19  ;;  %v1173_v33 = vmul.f32 %v1171_v44, %v590_v19 }
 0x144   : > { %v596_v42 = vmul.f32 %v595_v38, %v585_v20  ;;  %v822_v28 = vmul.f32 %v821_v39, %v585_v20  ;;  %v997_v30 = vmul.f32 %v996_v40, %v585_v20  ;;  %v1172_v36 = vmul.f32 %v1171_v44, %v585_v20 }
 0x145   : > { %v599_v17 = vadd.f32 %v597_v21, %v581_v22  ;;  %v825_v31 = vadd.f32 %v823_v25, %v817_v26  ;;  %v1000_v43 = vadd.f32 %v998_v29, %v992_v37  ;;  %v1175_v61 = vadd.f32 %v1173_v33, %v1167_v41 }
 0x146   : > { %v608_v34 = vpop.permute.xlu1 %607  ;;  %v603_v35 = vpop.permute.xlu0 %602  ;;  %v598_v6 = vadd.f32 %v596_v42, %v580_v27  ;;  %v824_v40 = vadd.f32 %v822_v28, %v816_v47  ;;  %v999_v8 = vadd.f32 %v997_v30, %v991_v32  ;;  %v1174_v12 = vadd.f32 %v1172_v36, %v1166_v60 }
 0x147   : > { %v615_v2 = vmul.f32 %v2647_v45, %v608_v34  ;;  %v831_v3 = vmul.f32 %v2649_v46, %v608_v34  ;;  %v1006_v7 = vmul.f32 %v2651_v48, %v608_v34  ;;  %v1181_v38 = vmul.f32 %v2653_v49, %v608_v34 }
 0x148   : > { %v614_v39 = vmul.f32 %v2647_v45, %v603_v35  ;;  %v830_v9 = vmul.f32 %v2649_v46, %v603_v35  ;;  %v1005_v10 = vmul.f32 %v2651_v48, %v603_v35  ;;  %v1180_v13 = vmul.f32 %v2653_v49, %v603_v35 }
 0x149   : > { %v617_v16 = vadd.f32 %v615_v2, %v599_v17  ;;  %v833_v18 = vadd.f32 %v831_v3, %v825_v31  ;;  %v1008_v20 = vadd.f32 %v1006_v7, %v1000_v43  ;;  %v1183_v23 = vadd.f32 %v1181_v38, %v1175_v61 }
 0x14a   : > { %v626_v44 = vpop.permute.xlu1 %625  ;;  %v621_v11 = vpop.permute.xlu0 %620  ;;  %v616_v46 = vadd.f32 %v614_v39, %v598_v6  ;;  %v832_v24 = vadd.f32 %v830_v9, %v824_v40  ;;  %v1007_v21 = vadd.f32 %v1005_v10, %v999_v8  ;;  %v1182_v29 = vadd.f32 %v1180_v13, %v1174_v12 }
 0x14b   : > { %v633_v14 = vmul.f32 %v2655_v50, %v626_v44  ;;  %v839_v15 = vmul.f32 %v2657_v51, %v626_v44  ;;  %v1014_v19 = vmul.f32 %v2659_v52, %v626_v44  ;;  %v1189_v45 = vmul.f32 %v2661_v53, %v626_v44 }
 0x14c   : > { %v1013_v48 = vmul.f32 %v2659_v52, %v621_v11  ;;  %v632_v25 = vmul.f32 %v2655_v50, %v621_v11  ;;  %v1188_v49 = vmul.f32 %v2661_v53, %v621_v11  ;;  %v838_v37 = vmul.f32 %v2657_v51, %v621_v11 }
 0x14d   : > { %v635_v17 = vadd.f32 %v633_v14, %v617_v16  ;;  %v841_v33 = vadd.f32 %v839_v15, %v833_v18  ;;  %v1016_v41 = vadd.f32 %v1014_v19, %v1008_v20  ;;  %v1191_v27 = vadd.f32 %v1189_v45, %v1183_v23 }
 0x14e   : > { %v644_v22 = vpop.permute.xlu1 %643  ;;  %v639_v26 = vpop.permute.xlu0 %638  ;;  %v1015_v52 = vadd.f32 %v1013_v48, %v1007_v21  ;;  %v1190_v28 = vadd.f32 %v1188_v49, %v1182_v29  ;;  %v634_v60 = vadd.f32 %v632_v25, %v616_v46  ;;  %v840_v61 = vadd.f32 %v838_v37, %v832_v24  ;;  %v517_v29 = vld [vmem:[%s2566_s25 + $0x8] sm:$0xff]  ;;  %v516_v37 = vld [vmem:[%s2566_s25] sm:$0xff] }
 0x14f   : > { %v651_v42 = vmul.f32 %v2663_v54, %v644_v22  ;;  %v847_v47 = vmul.f32 %v2665_v55, %v644_v22  ;;  %v1022_v32 = vmul.f32 %v2667_v56, %v644_v22  ;;  %v650_v50 = vmul.f32 %v2663_v54, %v639_v26 }
 0x150   : > { %v846_v53 = vmul.f32 %v2665_v55, %v639_v26  ;;  %v1021_v30 = vmul.f32 %v2667_v56, %v639_v26  ;;  %v1196_v34 = vmul.f32 %v2669_v57, %v639_v26  ;;  %v1197_v31 = vmul.f32 %v2669_v57, %v644_v22  ;;  %v3474_v22 = vld [vmem:[#allocation23_spill] sm:$0xff] }
 0x151   : > { %v653_v2 = vadd.f32 %v651_v42, %v635_v17  ;;  %v849_v54 = vadd.f32 %v847_v47, %v841_v33  ;;  %v1024_v6 = vadd.f32 %v1022_v32, %v1016_v41  ;;  %v652_v7 = vadd.f32 %v650_v50, %v634_v60  ;;  %v2809_v41 = vld [vmem:[%s2566_s25 + $0x18] sm:$0xff] }
 0x152   : > { %v662_v51 = vpop.permute.xlu1 %661  ;;  %v657_v35 = vpop.permute.xlu0 %656  ;;  %v848_v38 = vadd.f32 %v846_v53, %v840_v61  ;;  %v1023_v39 = vadd.f32 %v1021_v30, %v1015_v52  ;;  %v1198_v40 = vadd.f32 %v1196_v34, %v1190_v28  ;;  %v1199_v24 = vadd.f32 %v1197_v31, %v1191_v27  ;;  %v518_v53 = vld [vmem:[%s2566_s25 + $0x10] sm:$0xff]  ;;  %v2825_v28 = vld [vmem:[%s2566_s25 + $0x28] sm:$0xff] }
 0x153   : > { %v669_v36 = vmul.f32 %v2671_v58, %v662_v51  ;;  %v855_v43 = vmul.f32 %v2673_v59, %v662_v51  ;;  %v668_v55 = vmul.f32 %v2671_v58, %v657_v35  ;;  %v854_v3 = vmul.f32 %v2673_v59, %v657_v35 }
 0x154   : > { %v1029_v56 = vmul.f32 %v2675_v62, %v657_v35  ;;  %v1204_v57 = vmul.f32 %v2677_v63, %v657_v35  ;;  %v1030_v16 = vmul.f32 %v2675_v62, %v662_v51  ;;  %v1205_v18 = vmul.f32 %v2677_v63, %v662_v51  ;;  %v2831_v35 = vld [vmem:[%s2566_s25 + $0x38] sm:$0xff] }
 0x155   : > { %v671_v8 = vadd.f32 %v669_v36, %v653_v2  ;;  %v857_v44 = vadd.f32 %v855_v43, %v849_v54  ;;  %v670_v12 = vadd.f32 %v668_v55, %v652_v7  ;;  %v856_v13 = vadd.f32 %v854_v3, %v848_v38  ;;  %v520_v7 = vld [vmem:[%s2566_s25 + $0x20] sm:$0xff] }
 0x156   : > { %v680_v9 = vpop.permute.xlu1 %679  ;;  %v675_v10 = vpop.permute.xlu0 %674  ;;  %v1031_v19 = vadd.f32 %v1029_v56, %v1023_v39  ;;  %v1206_v21 = vadd.f32 %v1204_v57, %v1198_v40  ;;  %v1032_v63 = vadd.f32 %v1030_v16, %v1024_v6  ;;  %v1330_v26 = vstv %s1329_s5  ;;  %s2781_s5 = sld [smem:[#allocation7 + $0x182]] }
 0x157   : > { %v1037_v11 = vmul.f32 %v2679_v0, %v675_v10  ;;  %v686_v58 = vmul.f32 %v2683_v4, %v675_v10  ;;  %v687_v59 = vmul.f32 %v2683_v4, %v680_v9  ;;  %v862_v14 = vmul.f32 %v2685_v5, %v675_v10  ;;  %1333 = vst.msk [vmem:[%s2745_s22 + $0x8] sm:$0xff] %vm1331_vm1, %v1330_v26 }
 0x158   : > { %v863_v15 = vmul.f32 %v2685_v5, %v680_v9  ;;  %v1212_v45 = vmul.f32 %v2681_v1, %v675_v10  ;;  %v1038_v25 = vmul.f32 %v2679_v0, %v680_v9  ;;  %v1213_v4 = vmul.f32 %v2681_v1, %v680_v9  ;;  %1335 = vst.msk [vmem:[%s2745_s22 + $0x10] sm:$0x3] %vm1334_vm2, %v1330_v26 }
 0x159   : > { %v688_v20 = vadd.f32 %v686_v58, %v670_v12  ;;  %v864_v23 = vadd.f32 %v862_v14, %v856_v13  ;;  %v689_v46 = vadd.f32 %v687_v59, %v671_v8  ;;  %v1039_v62 = vadd.f32 %v1037_v11, %v1031_v19  ;;  %1332 = vst.msk [vmem:[%s2745_s22] sm:$0xff] %vm1331_vm1, %v1330_v26  ;;  %s2818_s22 = sld [smem:[#allocation10 + $0x101]] }
 0x15a   : > { %v865_v48 = vadd.f32 %v863_v15, %v857_v44  ;;  %v1207_v5 = vadd.f32 %v1205_v18, %v1199_v24  ;;  %v1214_v49 = vadd.f32 %v1212_v45, %v1206_v21  ;;  %v1040_v0 = vadd.f32 %v1038_v25, %v1032_v63 }
 0x15b   : > { %1999 = vmatprep.mubr.msk.f32.mxu0 %vm690_vm0, %v688_v20  ;;  %2004 = vmatprep.mubr.msk.f32.mxu1 %vm690_vm0, %v864_v23  ;;  %v775_v17 = vstv %s2753_s19  ;;  %v773_v27 = vstv %s2757_s28  ;;  %v781_v42 = vstv %s2759_s11  ;;  %s2813_s19 = sld [smem:[#allocation10 + $0x1]]  ;;  %v950_v47 = vstv %s2755_s30 }
 0x15c   : > { %2000 = vmatmul.mubr.msk.f32.vlgmr.msra.gmra.mxu0 %vm690_vm0, %v689_v46  ;;  %2005 = vmatmul.mubr.msk.f32.vlgmr.msra.gmra.mxu1 %vm690_vm0, %v865_v48  ;;  %v1215_v1 = vadd.f32 %v1213_v4, %v1207_v5  ;;  %v777_v33 = vmul.f32 %v775_v17, %v517_v29  ;;  %v776_v52 = vmul.f32 %v775_v17, %v516_v37  ;;  %v787_v30 = vstv %s2761_s0  ;;  %s2828_s30 = sld [smem:[#allocation11 + $0x2]]  ;;  %v522_v20 = vld [vmem:[%s2566_s25 + $0x30] sm:$0xff] }
 0x15d   : > { %2008 = vmatpush3.msra.mxu0 %v3474_v22  ;;  %2009 = vmatprep.mubr.msk.f32.mxu0 %vm690_vm0, %v1039_v62  ;;  %v783_v50 = vmul.f32 %v781_v42, %v2809_v41  ;;  %v952_v34 = vmul.f32 %v950_v47, %v517_v29  ;;  %v951_v51 = vmul.f32 %v950_v47, %v516_v37  ;;  %v793_v60 = vstv %s2765_s24  ;;  %s2836_s28 = sld [smem:[#allocation10 + $0x2]] }
 0x15e   : > { %2014 = vmatprep.mubr.msk.f32.mxu1 %vm690_vm0, %v1214_v49  ;;  %2013 = vmatpush3.msra.mxu1 %v3474_v22  ;;  %v779_v32 = vadd.f32 %v777_v33, %v773_v27  ;;  %v948_v31 = vstv %s2763_s21  ;;  %v1125_v36 = vstv %s2775_s23  ;;  %v778_v43 = vadd.f32 %v776_v52, %v773_v27  ;;  %s2838_s11 = sld [smem:[#allocation10 + $0x82]] }
 0x15f   : > { %3479 = sst [smem:[#allocation27_spill]] %s2818_s22  ;;  %v782_v61 = vmul.f32 %v781_v42, %v518_v53  ;;  %v789_v54 = vmul.f32 %v787_v30, %v2825_v28  ;;  %v956_v55 = vstv %s2767_s13  ;;  %v1300_v3 = vstv %s2785_s18 }
 0x160   : > { %2010 = vmatmul.mubr.msk.f32.vlgmr.msra.gmra.mxu0 %vm690_vm0, %v1040_v0  ;;  %2015 = vmatmul.mubr.msk.f32.vlgmr.msra.gmra.mxu1 %vm690_vm0, %v1215_v1  ;;  %v785_v2 = vadd.f32 %v783_v50, %v779_v32  ;;  %s2843_s0 = sld [smem:[#allocation10 + $0x102]]  ;;  %v2846_v6 = vmul.f32 %v793_v60, %v2831_v35  ;;  %v954_v56 = vadd.f32 %v952_v34, %v948_v31  ;;  %v962_v40 = vstv %s2769_s7 }
 0x161   : > { %v953_v38 = vadd.f32 %v951_v51, %v948_v31  ;;  %v1127_v39 = vmul.f32 %v1125_v36, %v517_v29  ;;  %s2849_s21 = sld [smem:[#allocation10 + $0x182]]  ;;  %v1123_v8 = vstv %s2773_s16  ;;  %v1131_v57 = vstv %s2777_s20 }
 0x162   : > { %3481 = sst [smem:[#allocation29_spill]] %s2828_s30  ;;  %v1126_v9 = vmul.f32 %v1125_v36, %v516_v37  ;;  %v958_v10 = vmul.f32 %v956_v55, %v2809_v41  ;;  %v784_v44 = vadd.f32 %v782_v61, %v778_v43  ;;  %v957_v11 = vmul.f32 %v956_v55, %v518_v53 }
 0x163   : > { %3482 = sst [smem:[#allocation30_spill]] %s2836_s28  ;;  %v1302_v12 = vmul.f32 %v1300_v3, %v517_v29  ;;  %v788_v13 = vmul.f32 %v787_v30, %v520_v7  ;;  %v1298_v58 = vstv %s2783_s6  ;;  %v1306_v59 = vstv %s2787_s2 }
 0x164   : > { %s2854_s24 = sld [smem:[#allocation11 + $0x3]]  ;;  %v1301_v14 = vmul.f32 %v1300_v3, %v516_v37  ;;  %v791_v15 = vadd.f32 %v789_v54, %v785_v2  ;;  %v964_v16 = vmul.f32 %v962_v40, %v2825_v28  ;;  %v1129_v18 = vadd.f32 %v1127_v39, %v1123_v8 }
 0x165   : > { %s2857_s13 = sld [smem:[#allocation10 + $0x3]]  ;;  %v1133_v19 = vmul.f32 %v1131_v57, %v2809_v41  ;;  %v968_v45 = vstv %s2771_s27  ;;  %v1137_v23 = vstv %s2779_s29  ;;  %v1128_v46 = vadd.f32 %v1126_v9, %v1123_v8 }
 0x166   : > { %3483 = sst [smem:[#allocation31_spill]] %s2843_s0  ;;  %v1132_v48 = vmul.f32 %v1131_v57, %v518_v53  ;;  %v960_v24 = vadd.f32 %v958_v10, %v954_v56  ;;  %v959_v21 = vadd.f32 %v957_v11, %v953_v38  ;;  %v1304_v25 = vadd.f32 %v1302_v12, %v1298_v58 }
 0x167   : > { %3484 = sst [smem:[#allocation32_spill]] %s2849_s21  ;;  %v1308_v4 = vmul.f32 %v1306_v59, %v2809_v41  ;;  %v963_v62 = vmul.f32 %v962_v40, %v520_v7  ;;  %v1312_v63 = vstv %s2789_s3  ;;  %v1303_v5 = vadd.f32 %v1301_v14, %v1298_v58 }
 0x168   : > { %s2861_s7 = sld [smem:[#allocation10 + $0x83]]  ;;  %v1307_v49 = vmul.f32 %v1306_v59, %v518_v53  ;;  %v790_v22 = vadd.f32 %v788_v13, %v784_v44  ;;  %v794_v0 = vmul.f32 %v793_v60, %v522_v20  ;;  %v1135_v1 = vadd.f32 %v1133_v19, %v1129_v18 }
 0x169   : > { %s2865_s16 = sld [smem:[#allocation10 + $0x103]]  ;;  %v1139_v26 = vmul.f32 %v1137_v23, %v2825_v28  ;;  %v970_v29 = vmul.f32 %v968_v45, %v2831_v35  ;;  %v1143_v17 = vstv %s2781_s5  ;;  %v1134_v33 = vadd.f32 %v1132_v48, %v1128_v46 }
 0x16a   : > { %3485 = sst [smem:[#allocation33_spill]] %s2854_s24  ;;  %v1138_v37 = vmul.f32 %v1137_v23, %v520_v7  ;;  %v966_v41 = vadd.f32 %v964_v16, %v960_v24  ;;  %v969_v27 = vmul.f32 %v968_v45, %v522_v20  ;;  %v1310_v42 = vadd.f32 %v1308_v4, %v1304_v25 }
 0x16b   : > { %s2870_s23 = sld [smem:[#allocation10 + $0x183]]  ;;  %v1314_v47 = vmul.f32 %v1312_v63, %v2825_v28  ;;  %v965_v52 = vadd.f32 %v963_v62, %v959_v21  ;;  %v1318_v32 = vstv %s2791_s4  ;;  %v1309_v50 = vadd.f32 %v1307_v49, %v1303_v5 }
 0x16c   : > { %s2873_s2 = sld [smem:[#allocation11 + $0x4]]  ;;  %v1313_v53 = vmul.f32 %v1312_v63, %v520_v7  ;;  %v1141_v30 = vadd.f32 %v1139_v26, %v1135_v1  ;;  %v1145_v34 = vmul.f32 %v1143_v17, %v2831_v35  ;;  %v1140_v51 = vadd.f32 %v1138_v37, %v1134_v33 }
 0x16d   : > { %s2876_s20 = sld [smem:[#allocation10 + $0x4]]  ;;  %v1144_v60 = vmul.f32 %v1143_v17, %v522_v20  ;;  %v2897_v28 = vadd.f32 %v2846_v6, %v791_v15  ;;  %v2899_v31 = vadd.f32 %v794_v0, %v790_v22  ;;  %v1316_v36 = vadd.f32 %v1314_v47, %v1310_v42 }
 0x16e   : > { %s2879_s25 = sld [smem:[#allocation10 + $0x84]]  ;;  %v1320_v43 = vmul.f32 %v1318_v32, %v2831_v35  ;;  %v2904_v61 = vadd.f32 %v970_v29, %v966_v41  ;;  %v2906_v2 = vadd.f32 %v969_v27, %v965_v52  ;;  %v1315_v54 = vadd.f32 %v1313_v53, %v1309_v50 }
 0x16f   : > { %s2883_s27 = sld [smem:[#allocation10 + $0x104]]  ;;  %v1319_v55 = vmul.f32 %v1318_v32, %v522_v20  ;;  %v2910_v3 = vadd.f32 %v1145_v34, %v1141_v30  ;;  %v2915_v6 = vadd.f32 %v1144_v60, %v1140_v51  ;;  %v801_v35 = vmax.f32 %v2897_v28, 0.0 }
 0x170   : > { %s2886_s3 = sld [smem:[#allocation10 + $0x184]]  ;;  %v2920_v56 = vadd.f32 %v1320_v43, %v1316_v36  ;;  %v976_v7 = vmax.f32 %v2904_v61, 0.0  ;;  %v800_v38 = vmax.f32 %v2899_v31, 0.0  ;;  %v975_v39 = vmax.f32 %v2906_v2, 0.0 }
 0x171   : > { %s2889_s29 = sld [smem:[#allocation11 + $0x5]]  ;;  %v2927_v40 = vadd.f32 %v1319_v55, %v1315_v54  ;;  %v1151_v8 = vmax.f32 %v2910_v3, 0.0  ;;  %v1337_v57 = vstv %s2793_s8  ;;  %v1339_v9 = vstv %s2795_s9 }
 0x172   : > { %s2892_s5 = sld [smem:[#allocation10 + $0x5]]  ;;  %v1345_v10 = vstv %s2799_s10  ;;  %v1150_v44 = vmax.f32 %v2915_v6, 0.0  ;;  %v1351_v11 = vstv %s2801_s26  ;;  %v1357_v12 = vstv %s2803_s15 }
 0x173   : > { %s2894_s6 = sld [smem:[#allocation10 + $0x85]]  ;;  %v1382_v13 = vstv %s2806_s14  ;;  %v1326_v58 = vmax.f32 %v2920_v56, 0.0  ;;  %v1384_v59 = vstv %s2813_s19  ;;  %v1390_v14 = vstv %s2816_s12  ;;  %s2312_s12 = smov 1  }
 0x174   : > { %s2902_s4 = sld [smem:[#allocation10 + $0x105]]  ;;  %v1396_v15 = vstv %s2818_s22  ;;  %v1325_v19 = vmax.f32 %v2927_v40, 0.0  ;;  %v1402_v45 = vstv %s2822_s1  ;;  %v1426_v20 = vstv %s2828_s30 }
 0x175   : > { %s2908_s18 = sld [smem:[#allocation10 + $0x185]]  ;;  %v1428_v23 = vstv %s2836_s28  ;;  %v1434_v46 = vstv %s2838_s11  ;;  %v1440_v48 = vstv %s2843_s0  ;;  %v1446_v24 = vstv %s2849_s21 }
 0x176   : > { %3486 = sst [smem:[#allocation34_spill]] %s2886_s3  ;;  %v1470_v21 = vstv %s2854_s24  ;;  %v1472_v62 = vstv %s2857_s13  ;;  %v1478_v63 = vstv %s2861_s7  ;;  %v1484_v5 = vstv %s2865_s16 }
 0x177   : > { %3487 = sst [smem:[#allocation35_spill]] %s2889_s29  ;;  %v1490_v49 = vstv %s2870_s23  ;;  %v1514_v22 = vstv %s2873_s2  ;;  %v1516_v0 = vstv %s2876_s20  ;;  %v1522_v1 = vstv %s2879_s25 }
 0x178   : > { %3488 = sst [smem:[#allocation36_spill]] %s2892_s5  ;;  %s1984_s5 = sshll.u32 %s3537_s17, 6  ;;  %v1528_v26 = vstv %s2883_s27 }
 0x179   : > { %3489 = sst [smem:[#allocation37_spill]] %s2894_s6 }
 0x17a   : > { %3490 = sst [smem:[#allocation38_spill]] %s2902_s4 }
 0x17b   : > { %3491 = sst [smem:[#allocation39_spill]] %s2908_s18 }
 0x17c   : > { %s2912_s6 = sld [smem:[#allocation11 + $0x6]] }
 0x17d   : > { %s2917_s29 = sld [smem:[#allocation10 + $0x6]] }
 0x17e   : > { %s2922_s18 = sld [smem:[#allocation10 + $0x86]] }
 0x17f   : > { %s2929_s17 = sld [smem:[#allocation10 + $0x106]] }
 0x180   : > { %s3495_s4 = sld [smem:[#allocation47_spill]] }
 0x181   : > { %s3500_s15 = sld [smem:[#allocation35_spill]] }
 0x182   : > { %3492 = sst [smem:[#allocation40_spill]] %s2912_s6 }
 0x183   : > { %3493 = sst [smem:[#allocation41_spill]] %s2917_s29 }
 0x184   : > { %3494 = sst [smem:[#allocation42_spill]] %s2922_s18 }
 0x185   : > { %s2940_s18 = sld [smem:[#allocation10 + $0x186]] }
 0x186   : > { %s2934_s3 = scalar_lea.vmem %s3495_s4, %s1984_s5  ;;  %s2946_s29 = sld [smem:[#allocation11 + $0x7]] }
 0x187   : > { %s2952_s5 = sld [smem:[#allocation10 + $0x7]]  ;;  %v509_v16 = vld [vmem:[%s2934_s3 + $0x8] sm:$0xff]  ;;  %v511_v18 = vld [vmem:[%s2934_s3 + $0x18] sm:$0xff]  ;;  %v508_v25 = vld [vmem:[%s2934_s3] sm:$0xff]  ;;  %v1558_v37 = vstv %s3500_s15 }
 0x188   : > { %s2960_s6 = sld [smem:[#allocation10 + $0x87]]  ;;  %v510_v4 = vld [vmem:[%s2934_s3 + $0x10] sm:$0xff]  ;;  %v513_v52 = vld [vmem:[%s2934_s3 + $0x28] sm:$0xff]  ;;  %v515_v32 = vld [vmem:[%s2934_s3 + $0x38] sm:$0xff] }
 0x189   : > { %s3499_s4 = sld [smem:[#allocation34_spill]] }
 0x18a   : > { %s3501_s22 = sld [smem:[#allocation36_spill]] }
 0x18b   : > { %s3502_s26 = sld [smem:[#allocation37_spill]]  ;;  %v1622_v36 = vstv %s2940_s18 }
 0x18c   : > { %3496 = sst [smem:[#allocation43_spill]] %s2946_s29  ;;  %v1646_v43 = vstv %s2946_s29 }
 0x18d   : > { %3497 = sst [smem:[#allocation44_spill]] %s2952_s5  ;;  %v1648_v60 = vstv %s2952_s5 }
 0x18e   : > { %3498 = sst [smem:[#allocation45_spill]] %s2960_s6  ;;  %v1654_v28 = vstv %s2960_s6 }
 0x18f   : > { %s3503_s30 = sld [smem:[#allocation38_spill]]  ;;  %v1534_v33 = vstv %s3499_s4 }
 0x190   : > { %s2972_s28 = sld [smem:[#allocation10 + $0x107]]  ;;  %v1560_v41 = vstv %s3501_s22 }
 0x191   : > { %s3505_s1 = sld [smem:[#allocation39_spill]]  ;;  %v1566_v27 = vstv %s3502_s26 }
 0x192   : > { %s3506_s21 = sld [smem:[#allocation40_spill]] }
 0x193   : > { %s3507_s24 = sld [smem:[#allocation41_spill]] }
 0x194   : > { %s3508_s0 = sld [smem:[#allocation42_spill]] }
 0x195   : > { %v1572_v50 = vstv %s3503_s30  ;;  %s3199_s11 = sld [smem:[#allocation13 + $0x2]] }
 0x196   : > { %3504 = sst [smem:[#allocation34_spill]] %s2972_s28 }
 0x197   : > { %v1578_v53 = vstv %s3505_s1  ;;  %s2998_s1 = sld [smem:[#allocation10 + $0x187]] }
 0x198   : > { %s3203_s22 = sld [smem:[#allocation13 + $0x3]] }
 0x199   : > { %s3218_s15 = sld [smem:[#allocation13 + $0x4]] }
 0x19a   : > { %s3220_s30 = sld [smem:[#allocation13 + $0x5]] }
 0x19b   : > { %s3233_s16 = sld [smem:[#allocation13 + $0x6]] }
 0x19c   : > { %s3239_s2 = sld [smem:[#allocation13 + $0x7]] }
 0x21c   : > { %v2001_v29 = vpop.f32.mrf.mxu0  ;;  %v2006_v17 = vpop.f32.mrf.mxu1 }
 0x21d   : > { %v799_v42 = vadd.f32 %v2001_v29, %v509_v16  ;;  %v974_v47 = vadd.f32 %v2006_v17, %v511_v18  ;;  %v512_v18 = vld [vmem:[%s2934_s3 + $0x20] sm:$0xff]  ;;  %v514_v29 = vld [vmem:[%s2934_s3 + $0x30] sm:$0xff] }
 0x21e   : > { %v763_v30 = vpop.f32.mrf.mxu0  ;;  %v938_v34 = vpop.f32.mrf.mxu1 }
 0x21f   : > { %v2992_v61 = vadd.f32 %v801_v35, %v799_v42  ;;  %v2994_v54 = vadd.f32 %v976_v7, %v974_v47  ;;  %v798_v55 = vadd.f32 %v763_v30, %v508_v25  ;;  %v973_v16 = vadd.f32 %v938_v34, %v510_v4 }
 0x220   : > { %v2011_v17 = vpop.f32.mrf.mxu0  ;;  %v2016_v51 = vpop.f32.mrf.mxu1 }
 0x221   : > { %v3006_v35 = vadd.f32 %v800_v38, %v798_v55  ;;  %v3010_v7 = vadd.f32 %v975_v39, %v973_v16  ;;  %v1149_v25 = vadd.f32 %v2011_v17, %v513_v52  ;;  %v1324_v4 = vadd.f32 %v2016_v51, %v515_v32 }
 0x222   : > { %v1113_v42 = vpop.f32.mrf.mxu0  ;;  %v1288_v47 = vpop.f32.mrf.mxu1  ;;  %v1341_v30 = vmul.f32 %v1339_v9, %v2992_v61  ;;  %v1347_v31 = vmul.f32 %v1345_v10, %v2994_v54  ;;  %v1386_v2 = vmul.f32 %v1384_v59, %v2992_v61  ;;  %v1660_v38 = vstv %s2972_s28  ;;  %s3187_s28 = sld [smem:[#allocation13 + $0x1]] }
 0x223   : > { %v3024_v39 = vadd.f32 %v1151_v8, %v1149_v25  ;;  %v3028_v52 = vadd.f32 %v1326_v58, %v1324_v4  ;;  %v1148_v32 = vadd.f32 %v1113_v42, %v512_v18  ;;  %v1323_v34 = vadd.f32 %v1288_v47, %v514_v29 }
 0x224   : > { %v1343_v51 = vadd.f32 %v1341_v30, %v1337_v57  ;;  %v1340_v55 = vmul.f32 %v1339_v9, %v3006_v35  ;;  %v1388_v3 = vadd.f32 %v1386_v2, %v1382_v13  ;;  %v1392_v8 = vmul.f32 %v1390_v14, %v2994_v54 }
 0x225   : > { %v3042_v56 = vadd.f32 %v1150_v44, %v1148_v32  ;;  %v3046_v58 = vadd.f32 %v1325_v19, %v1323_v34  ;;  %v1353_v16 = vmul.f32 %v1351_v11, %v3024_v39  ;;  %v1346_v9 = vmul.f32 %v1345_v10, %v3010_v7 }
 0x226   : > { %v1349_v18 = vadd.f32 %v1347_v31, %v1343_v51  ;;  %v1342_v6 = vadd.f32 %v1340_v55, %v1337_v57  ;;  %v1394_v29 = vadd.f32 %v1392_v8, %v1388_v3  ;;  %v1398_v40 = vmul.f32 %v1396_v15, %v3024_v39 }
 0x227   : > { %v1359_v44 = vmul.f32 %v1357_v12, %v3028_v52  ;;  %v1352_v19 = vmul.f32 %v1351_v11, %v3042_v56  ;;  %v1385_v17 = vmul.f32 %v1384_v59, %v3006_v35  ;;  %v1666_v10 = vstv %s2998_s1 }
 0x228   : > { %v1355_v25 = vadd.f32 %v1353_v16, %v1349_v18  ;;  %v1348_v57 = vadd.f32 %v1346_v9, %v1342_v6  ;;  %v1400_v4 = vadd.f32 %v1398_v40, %v1394_v29  ;;  %v1404_v42 = vmul.f32 %v1402_v45, %v3028_v52 }
 0x229   : > { %v1387_v47 = vadd.f32 %v1385_v17, %v1382_v13  ;;  %v1391_v11 = vmul.f32 %v1390_v14, %v3010_v7  ;;  %v1397_v30 = vmul.f32 %v1396_v15, %v3042_v56  ;;  %v1430_v59 = vmul.f32 %v1428_v23, %v2992_v61 }
 0x22a   : > { %v1361_v31 = vadd.f32 %v1359_v44, %v1355_v25  ;;  %v1354_v2 = vadd.f32 %v1352_v19, %v1348_v57  ;;  %v1358_v32 = vmul.f32 %v1357_v12, %v3046_v58  ;;  %v1406_v34 = vadd.f32 %v1404_v42, %v1400_v4 }
 0x22b   : > { %v1393_v51 = vadd.f32 %v1391_v11, %v1387_v47  ;;  %v1432_v13 = vadd.f32 %v1430_v59, %v1426_v20  ;;  %v1436_v14 = vmul.f32 %v1434_v46, %v2994_v54  ;;  %v1442_v15 = vmul.f32 %v1440_v48, %v3024_v39 }
 0x22c   : > { %v1363_v55 = vmax.f32 %v1361_v31, 0.0  ;;  %v1360_v3 = vadd.f32 %v1358_v32, %v1354_v2  ;;  %v1403_v8 = vmul.f32 %v1402_v45, %v3046_v58  ;;  %v1429_v12 = vmul.f32 %v1428_v23, %v3006_v35 }
 0x22d   : > { %v1399_v16 = vadd.f32 %v1397_v30, %v1393_v51  ;;  %v1438_v9 = vadd.f32 %v1436_v14, %v1432_v13  ;;  %v1448_v18 = vmul.f32 %v1446_v24, %v3028_v52  ;;  %v1435_v6 = vmul.f32 %v1434_v46, %v3010_v7 }
 0x22e   : > { %1368 = vrot.lane.b32.xlu1 %v1363_v55, %s2312_s12  ;;  %v1362_v29 = vmax.f32 %v1360_v3, 0.0  ;;  %v1431_v45 = vadd.f32 %v1429_v12, %v1426_v20  ;;  %v1441_v23 = vmul.f32 %v1440_v48, %v3042_v56  ;;  %v1474_v40 = vmul.f32 %v1472_v62, %v2992_v61 }
 0x22f   : > { %v1408_v44 = vmax.f32 %v1406_v34, 0.0  ;;  %v1405_v19 = vadd.f32 %v1403_v8, %v1399_v16  ;;  %v1444_v17 = vadd.f32 %v1442_v15, %v1438_v9  ;;  %v1480_v46 = vmul.f32 %v1478_v63, %v2994_v54 }
 0x230   : > { %1366 = vrot.lane.b32.xlu0 %v1362_v29, %s2312_s12  ;;  %v1437_v25 = vadd.f32 %v1435_v6, %v1431_v45  ;;  %v1476_v20 = vadd.f32 %v1474_v40, %v1470_v21  ;;  %v1486_v48 = vmul.f32 %v1484_v5, %v3024_v39  ;;  %v1473_v57 = vmul.f32 %v1472_v62, %v3006_v35 }
 0x231   : > { %v1407_v4 = vmax.f32 %v1405_v19, 0.0  ;;  %v1450_v42 = vadd.f32 %v1448_v18, %v1444_v17  ;;  %v1447_v47 = vmul.f32 %v1446_v24, %v3046_v58  ;;  %v1479_v11 = vmul.f32 %v1478_v63, %v3010_v7 }
 0x232   : > { %1413 = vrot.lane.b32.xlu1 %v1408_v44, %s2312_s12  ;;  %v1443_v30 = vadd.f32 %v1441_v23, %v1437_v25  ;;  %v1482_v59 = vadd.f32 %v1480_v46, %v1476_v20  ;;  %v1475_v31 = vadd.f32 %v1473_v57, %v1470_v21  ;;  %v1485_v62 = vmul.f32 %v1484_v5, %v3042_v56 }
 0x233   : > { %v1452_v2 = vmax.f32 %v1450_v42, 0.0  ;;  %v1492_v24 = vmul.f32 %v1490_v49, %v3028_v52  ;;  %v1491_v63 = vmul.f32 %v1490_v49, %v3046_v58  ;;  %v1518_v32 = vmul.f32 %v1516_v0, %v2992_v61 }
 0x234   : > { %1411 = vrot.lane.b32.xlu0 %v1407_v4, %s2312_s12  ;;  %v1449_v34 = vadd.f32 %v1447_v47, %v1443_v30  ;;  %v1488_v21 = vadd.f32 %v1486_v48, %v1482_v59  ;;  %v1481_v51 = vadd.f32 %v1479_v11, %v1475_v31  ;;  %v1524_v5 = vmul.f32 %v1522_v1, %v2994_v54 }
 0x235   : > { %v1520_v13 = vadd.f32 %v1518_v32, %v1514_v22  ;;  %v1530_v49 = vmul.f32 %v1528_v26, %v3024_v39  ;;  %v1536_v14 = vmul.f32 %v1534_v33, %v3028_v52  ;;  %v1517_v15 = vmul.f32 %v1516_v0, %v3006_v35 }
 0x236   : > { %1457 = vrot.lane.b32.xlu1 %v1452_v2, %s2312_s12  ;;  %v1451_v55 = vmax.f32 %v1449_v34, 0.0  ;;  %v1494_v3 = vadd.f32 %v1492_v24, %v1488_v21  ;;  %v1487_v8 = vadd.f32 %v1485_v62, %v1481_v51  ;;  %v1523_v12 = vmul.f32 %v1522_v1, %v3010_v7 }
 0x237   : > { %v1526_v16 = vadd.f32 %v1524_v5, %v1520_v13  ;;  %v1519_v9 = vadd.f32 %v1517_v15, %v1514_v22  ;;  %v1529_v18 = vmul.f32 %v1528_v26, %v3042_v56  ;;  %v1562_v0 = vmul.f32 %v1560_v41, %v2992_v61 }
 0x238   : > { %1455 = vrot.lane.b32.xlu0 %v1451_v55, %s2312_s12  ;;  %v1496_v6 = vmax.f32 %v1494_v3, 0.0  ;;  %v1493_v29 = vadd.f32 %v1491_v63, %v1487_v8  ;;  %v1568_v45 = vmul.f32 %v1566_v27, %v2994_v54  ;;  %v1574_v1 = vmul.f32 %v1572_v50, %v3024_v39 }
 0x239   : > { %v1532_v22 = vadd.f32 %v1530_v49, %v1526_v16  ;;  %v1525_v23 = vadd.f32 %v1523_v12, %v1519_v9  ;;  %v1564_v26 = vadd.f32 %v1562_v0, %v1558_v37  ;;  %v1561_v40 = vmul.f32 %v1560_v41, %v3006_v35 }
 0x23a   : > { %1501 = vrot.lane.b32.xlu1 %v1496_v6, %s2312_s12  ;;  %v1495_v44 = vmax.f32 %v1493_v29, 0.0  ;;  %v1535_v19 = vmul.f32 %v1534_v33, %v3046_v58  ;;  %v1567_v17 = vmul.f32 %v1566_v27, %v3010_v7  ;;  %v1573_v46 = vmul.f32 %v1572_v50, %v3042_v56 }
 0x23b   : > { %v1538_v25 = vadd.f32 %v1536_v14, %v1532_v22  ;;  %v1531_v41 = vadd.f32 %v1529_v18, %v1525_v23  ;;  %v1570_v20 = vadd.f32 %v1568_v45, %v1564_v26  ;;  %v1563_v48 = vadd.f32 %v1561_v40, %v1558_v37 }
 0x23c   : > { %1499 = vrot.lane.b32.xlu0 %v1495_v44, %s2312_s12  ;;  %v1580_v33 = vmul.f32 %v1578_v53, %v3028_v52  ;;  %v1579_v27 = vmul.f32 %v1578_v53, %v3046_v58  ;;  %v3519_v50 = vstv %s3507_s24  ;;  %v3520_v4 = vstv %s3508_s0  ;;  %s3531_s0 = sld [smem:[#allocation24_spill]] }
 0x23d   : > { %v1606_v57 = vmul.f32 %v3519_v50, %v2992_v61  ;;  %v1612_v42 = vmul.f32 %v3520_v4, %v2994_v54  ;;  %v1540_v37 = vmax.f32 %v1538_v25, 0.0  ;;  %v1537_v47 = vadd.f32 %v1535_v19, %v1531_v41 }
 0x23e   : > { %v1576_v11 = vadd.f32 %v1574_v1, %v1570_v20  ;;  %v1569_v30 = vadd.f32 %v1567_v17, %v1563_v48  ;;  %v3522_v59 = vstv %s3506_s21  ;;  %v3523_v31 = vstv %s2929_s17 }
 0x23f   : > { %v1608_v53 = vadd.f32 %v1606_v57, %v3522_v59  ;;  %v1618_v62 = vmul.f32 %v3523_v31, %v3024_v39  ;;  %v1624_v2 = vmul.f32 %v1622_v36, %v3028_v52  ;;  %v3524_v24 = vmov %v3519_v50  ;;  %1545 = vrot.lane.b32.xlu1 %v1540_v37, %s2312_s12 }
 0x240   : > { %v1605_v63 = vmul.f32 %v3524_v24, %v3006_v35  ;;  %v1539_v32 = vmax.f32 %v1537_v47, 0.0  ;;  %v1582_v34 = vadd.f32 %v1580_v33, %v1576_v11  ;;  %v1575_v21 = vadd.f32 %v1573_v46, %v1569_v30 }
 0x241   : > { %v3528_v51 = vmov %v3520_v4  ;;  %v1614_v13 = vadd.f32 %v1612_v42, %v1608_v53  ;;  %v3529_v49 = vmov %v3522_v59  ;;  %v3530_v15 = vmov %v3523_v31 }
 0x242   : > { %v1611_v5 = vmul.f32 %v3528_v51, %v3010_v7  ;;  %v1607_v14 = vadd.f32 %v1605_v63, %v3529_v49  ;;  %v1617_v55 = vmul.f32 %v3530_v15, %v3042_v56  ;;  %v1650_v3 = vmul.f32 %v1648_v60, %v2992_v61  ;;  %1543 = vrot.lane.b32.xlu0 %v1539_v32, %s2312_s12 }
 0x243   : > { %v1584_v8 = vmax.f32 %v1582_v34, 0.0  ;;  %v1581_v12 = vadd.f32 %v1579_v27, %v1575_v21  ;;  %v1656_v16 = vmul.f32 %v1654_v28, %v2994_v54  ;;  %v1662_v9 = vmul.f32 %v1660_v38, %v3024_v39 }
 0x244   : > { %v1620_v18 = vadd.f32 %v1618_v62, %v1614_v13  ;;  %v1613_v0 = vadd.f32 %v1611_v5, %v1607_v14  ;;  %v1652_v6 = vadd.f32 %v1650_v3, %v1646_v43  ;;  %v1649_v61 = vmul.f32 %v1648_v60, %v3006_v35 }
 0x245   : > { %1589 = vrot.lane.b32.xlu1 %v1584_v8, %s2312_s12  ;;  %v1583_v29 = vmax.f32 %v1581_v12, 0.0  ;;  %v1623_v54 = vmul.f32 %v1622_v36, %v3046_v58  ;;  %v1655_v39 = vmul.f32 %v1654_v28, %v3010_v7  ;;  %v1661_v45 = vmul.f32 %v1660_v38, %v3042_v56 }
 0x246   : > { %v1626_v1 = vadd.f32 %v1624_v2, %v1620_v18  ;;  %v1619_v22 = vadd.f32 %v1617_v55, %v1613_v0  ;;  %v1658_v60 = vadd.f32 %v1656_v16, %v1652_v6  ;;  %v1651_v35 = vadd.f32 %v1649_v61, %v1646_v43 }
 0x247   : > { %1587 = vrot.lane.b32.xlu0 %v1583_v29, %s2312_s12  ;;  %v1668_v36 = vmul.f32 %v1666_v10, %v3028_v52  ;;  %v1376_v28 = vstv %s3187_s28  ;;  %v1420_v7 = vstv %s3199_s11  ;;  %v1464_v38 = vstv %s3203_s22 }
 0x248   : > { %v1628_v56 = vmax.f32 %v1626_v1, 0.0  ;;  %v1625_v23 = vadd.f32 %v1623_v54, %v1619_v22  ;;  %v1664_v26 = vadd.f32 %v1662_v9, %v1658_v60  ;;  %v1657_v40 = vadd.f32 %v1655_v39, %v1651_v35  ;;  %1905 = vst.msk [vmem:[%s3531_s0 + $0x20] sm:$0xff] %vm1331_vm1, %v1376_v28  ;;  %1904 = vst.msk [vmem:[%s3531_s0 + $0x18] sm:$0xff] %vm1331_vm1, %v1376_v28 }
 0x249   : > { %1906 = vst.msk [vmem:[%s3531_s0 + $0x28] sm:$0x3] %vm1334_vm2, %v1376_v28  ;;  %1917 = vst.msk [vmem:[%s3531_s0 + $0x40] sm:$0x3] %vm1334_vm2, %v1420_v7  ;;  %v1508_v43 = vstv %s3218_s15  ;;  %v1552_v52 = vstv %s3220_s30  ;;  %v1667_v41 = vmul.f32 %v1666_v10, %v3046_v58 }
 0x24a   : > { %1916 = vst.msk [vmem:[%s3531_s0 + $0x38] sm:$0xff] %vm1331_vm1, %v1420_v7  ;;  %1915 = vst.msk [vmem:[%s3531_s0 + $0x30] sm:$0xff] %vm1331_vm1, %v1420_v7  ;;  %v1596_v44 = vstv %s3233_s16  ;;  %v1640_v19 = vstv %s3239_s2  ;;  %v1627_v17 = vmax.f32 %v1625_v23, 0.0  ;;  %v1670_v46 = vadd.f32 %v1668_v36, %v1664_v26 }
 0x24b   : > { %1927 = vst.msk [vmem:[%s3531_s0 + $0x50] sm:$0xff] %vm1331_vm1, %v1464_v38  ;;  %1926 = vst.msk [vmem:[%s3531_s0 + $0x48] sm:$0xff] %vm1331_vm1, %v1464_v38  ;;  %1633 = vrot.lane.b32.xlu1 %v1628_v56, %s2312_s12  ;;  %v1663_v25 = vadd.f32 %v1661_v45, %v1657_v40 }
 0x24c   : > { %1928 = vst.msk [vmem:[%s3531_s0 + $0x58] sm:$0x3] %vm1334_vm2, %v1464_v38  ;;  %1939 = vst.msk [vmem:[%s3531_s0 + $0x70] sm:$0x3] %vm1334_vm2, %v1508_v43  ;;  %1631 = vrot.lane.b32.xlu0 %v1627_v17, %s2312_s12  ;;  %v1672_v58 = vmax.f32 %v1670_v46, 0.0 }
 0x24d   : > { %1938 = vst.msk [vmem:[%s3531_s0 + $0x68] sm:$0xff] %vm1331_vm1, %v1508_v43  ;;  %1937 = vst.msk [vmem:[%s3531_s0 + $0x60] sm:$0xff] %vm1331_vm1, %v1508_v43  ;;  %v1669_v10 = vadd.f32 %v1667_v41, %v1663_v25 }
 0x24e   : > { %1949 = vst.msk [vmem:[%s3531_s0 + $0x80] sm:$0xff] %vm1331_vm1, %v1552_v52  ;;  %1948 = vst.msk [vmem:[%s3531_s0 + $0x78] sm:$0xff] %vm1331_vm1, %v1552_v52 }
 0x24f   : > { %1950 = vst.msk [vmem:[%s3531_s0 + $0x88] sm:$0x3] %vm1334_vm2, %v1552_v52  ;;  %1961 = vst.msk [vmem:[%s3531_s0 + $0xa0] sm:$0x3] %vm1334_vm2, %v1596_v44  ;;  %1677 = vrot.lane.b32.xlu1 %v1672_v58, %s2312_s12  ;;  %v1671_v20 = vmax.f32 %v1669_v10, 0.0 }
 0x250   : > { %1960 = vst.msk [vmem:[%s3531_s0 + $0x98] sm:$0xff] %vm1331_vm1, %v1596_v44  ;;  %1959 = vst.msk [vmem:[%s3531_s0 + $0x90] sm:$0xff] %vm1331_vm1, %v1596_v44 }
 0x251   : > { %1971 = vst.msk [vmem:[%s3531_s0 + $0xb0] sm:$0xff] %vm1331_vm1, %v1640_v19  ;;  %1970 = vst.msk [vmem:[%s3531_s0 + $0xa8] sm:$0xff] %vm1331_vm1, %v1640_v19  ;;  %1675 = vrot.lane.b32.xlu0 %v1671_v20, %s2312_s12 }
 0x252   : > { %1972 = vst.msk [vmem:[%s3531_s0 + $0xb8] sm:$0x3] %vm1334_vm2, %v1640_v19 }
 0x2a0   : > { %v1369_v48 = vpop.permute.xlu1 %1368 }
 0x2a1   : > { %1374 = vst.msk [vmem:[%s3531_s0 + $0x9] sm:$0xff] %vm1372_vm3, %v1369_v48 }
 0x2a2   : > { %v1367_v33 = vpop.permute.xlu0 %1366 }
 0x2a3   : > { %1373 = vst.msk [vmem:[%s3531_s0 + $0x1] sm:$0xff] %vm1372_vm3, %v1367_v33 }
 0x2a4   : > { %v1414_v27 = vpop.permute.xlu1 %1413 }
 0x2a5   : > { %1913 = vst.msk [vmem:[%s3531_s0 + $0x21] sm:$0xff] %vm1372_vm3, %v1414_v27 }
 0x2a6   : > { %v1412_v50 = vpop.permute.xlu0 %1411 }
 0x2a7   : > { %1912 = vst.msk [vmem:[%s3531_s0 + $0x19] sm:$0xff] %vm1372_vm3, %v1412_v50 }
 0x2a8   : > { %v1458_v57 = vpop.permute.xlu1 %1457 }
 0x2a9   : > { %1924 = vst.msk [vmem:[%s3531_s0 + $0x39] sm:$0xff] %vm1372_vm3, %v1458_v57 }
 0x2aa   : > { %v1456_v4 = vpop.permute.xlu0 %1455 }
 0x2ab   : > { %1923 = vst.msk [vmem:[%s3531_s0 + $0x31] sm:$0xff] %vm1372_vm3, %v1456_v4 }
 0x2ac   : > { %v1502_v42 = vpop.permute.xlu1 %1501 }
 0x2ad   : > { %1935 = vst.msk [vmem:[%s3531_s0 + $0x51] sm:$0xff] %vm1372_vm3, %v1502_v42 }
 0x2ae   : > { %v1500_v37 = vpop.permute.xlu0 %1499 }
 0x2af   : > { %1934 = vst.msk [vmem:[%s3531_s0 + $0x49] sm:$0xff] %vm1372_vm3, %v1500_v37 }
 0x2b1   : > { %v1546_v47 = vpop.permute.xlu1 %1545 }
 0x2b2   : > { %1946 = vst.msk [vmem:[%s3531_s0 + $0x69] sm:$0xff] %vm1372_vm3, %v1546_v47 }
 0x2b4   : > { %v1544_v11 = vpop.permute.xlu0 %1543 }
 0x2b5   : > { %1945 = vst.msk [vmem:[%s3531_s0 + $0x61] sm:$0xff] %vm1372_vm3, %v1544_v11 }
 0x2b7   : > { %v1590_v30 = vpop.permute.xlu1 %1589 }
 0x2b8   : > { %1957 = vst.msk [vmem:[%s3531_s0 + $0x81] sm:$0xff] %vm1372_vm3, %v1590_v30 }
 0x2b9   : > { %v1588_v59 = vpop.permute.xlu0 %1587 }
 0x2ba   : > { %1956 = vst.msk [vmem:[%s3531_s0 + $0x79] sm:$0xff] %vm1372_vm3, %v1588_v59 }
 0x2bd   : > { %v1634_v53 = vpop.permute.xlu1 %1633 }
 0x2be   : > { %1968 = vst.msk [vmem:[%s3531_s0 + $0x99] sm:$0xff] %vm1372_vm3, %v1634_v53  ;;  %v1632_v31 = vpop.permute.xlu0 %1631 }
 0x2bf   : > { %1967 = vst.msk [vmem:[%s3531_s0 + $0x91] sm:$0xff] %vm1372_vm3, %v1632_v31 }
 0x2c1   : > { %v1678_v62 = vpop.permute.xlu1 %1677 }
 0x2c2   : > { %1979 = vst.msk [vmem:[%s3531_s0 + $0xb1] sm:$0xff] %vm1372_vm3, %v1678_v62 }
 0x2c3   : > { %v1676_v2 = vpop.permute.xlu0 %1675 }
 0x2c4   : > { %1978 = vst.msk [vmem:[%s3531_s0 + $0xa9] sm:$0xff] %vm1372_vm3, %v1676_v2 }
 0x2c5 PF: > { %s3532_s16 = sld [smem:[#allocation21_spill]] }
 0x2c6   : > { %s3533_s13 = sld [smem:[#allocation19_spill]] }
 0x2c7   : > { %s3534_s14 = sld [smem:[#allocation20_spill]] }
 0x2c8   : > { %s3535_s15 = sld [smem:[#allocation22_spill]] }
 0x2cb   : > { %p26_p11 = scmp.ge.s32.totalorder %s3532_s16, 4  }
 0x2cd   :  { %28 = sbr.rel (!%p26_p11) target bundleno = 20 (0x14), region = 151 }
 0x2d2   :  { %1704 = vsyncpa [#allocation3], 1 }
 0x2d3   :  { %1706 = vsyncpa [#allocation3 + $0x1], 1 }
 0x2d4   :  { %1707 = vsyncpa [#allocation6], 1 }
 0x2d5   :  { %1709 = vsyncpa [#allocation6 + $0x1], 1 }
 0x2d6   :  { %1710 = vsyncpa [#allocation4], 1 }
 0x2d7   :  { %1712 = vsyncpa [#allocation4 + $0x1], 1 }
 0x2d8   :  { %1713 = vsyncpa [#allocation9], 1 }
 0x2d9   :  { %1714 = vsyncpa [#allocation12], 1 }

</bundles_post_ra>
